<compile_context>
chip_gen: v7x
topology: tpu7x:2x2x1
jax: 0.10.0
libtpu: 0.0.40
codegen_flags: <defaults>
</compile_context>

<pallas_src>
import functools

import jax
import jax.numpy as jnp
from jax.experimental import pallas as pl
from jax.experimental.pallas import tpu as pltpu


def _make_kernel(num_layers):
    """Builds the fused MLP kernel.

    Ref order (positional):
      inputs : x, w0, b0, w1, b1, ..., w{L-1}, b{L-1}
      outputs: act, psum0, psumsq0, ..., psum{L-1}, psumsq{L-1}
    """

    def kernel(*refs):
        x_ref = refs[0]
        wb_refs = refs[1:1 + 2 * num_layers]
        act_ref = refs[1 + 2 * num_layers]
        metric_refs = refs[2 + 2 * num_layers:]

        h = x_ref[...]                                    # f32 (tm, in_dim)
        for l in range(num_layers):
            w = wb_refs[2 * l][...]                       # (in_l, out_l) compute dtype
            b = wb_refs[2 * l + 1][...]                   # (1, out_l) f32
            # MXU matmul: activations cast to the weight dtype (bf16 by
            # default), accumulation in f32.
            z = jnp.dot(h.astype(w.dtype), w,
                        preferred_element_type=jnp.float32)
            z = z + b                                     # f32 (tm, out_l)
            # Lane-dense per-tile partial sums (sublane reduce only; the
            # single cross-lane reduce per layer happens in the wrapper).
            metric_refs[2 * l][0, :, :] = jnp.sum(z, axis=0, keepdims=True)
            metric_refs[2 * l + 1][0, :, :] = jnp.sum(z * z, axis=0,
                                                      keepdims=True)
            h = jnp.maximum(z, 0.0)                       # ReLU (every layer)

        act_ref[...] = h.astype(act_ref.dtype)

    return kernel


def vanilla_net_forward(x, weights_t, biases, *, tm=256,
                        single_buffer_weights=False):
    """Fused VanillaNet forward.

    x:         [B, input_dim] float32
    weights_t: list; weights_t[l] is [in_l, out_l] (pre-transposed at init),
               bf16 by default
    biases:    list; biases[l] is [1, out_l] float32
    Returns (activations [B, out_last] f32, activation_variance [L] f32,
             mean_squared_length [L] f32).
    """
    B, in_dim = x.shape
    num_layers = len(weights_t)
    dims = [in_dim] + [int(w.shape[1]) for w in weights_t]
    out_dims = tuple(dims[1:])
    out_last = dims[-1]

    tm = min(tm, B)
    assert tm % 8 == 0, "row tile must be a multiple of 8"
    assert B % tm == 0, "batch must be divisible by the row-tile size"
    n_tiles = B // tm

    # Weights/biases: constant index_maps -> DMA'd once per core, then
    # VMEM-resident across all batch tiles.  Optionally single-buffered.
    wb_kwargs = {}
    if single_buffer_weights:
        wb_kwargs = dict(pipeline_mode=pl.Buffered(1))

    in_specs = [pl.BlockSpec((tm, in_dim), lambda i: (i, 0))]
    for l in range(num_layers):
        in_specs.append(pl.BlockSpec((dims[l], dims[l + 1]),
                                     lambda i: (0, 0), **wb_kwargs))
        in_specs.append(pl.BlockSpec((1, dims[l + 1]),
                                     lambda i: (0, 0), **wb_kwargs))

    # Outputs: activations (pipelined per tile) + per-tile lane-dense partial
    # sums / sums-of-squares per layer (shape (n_tiles, 1, out_l): last two
    # block dims equal the full array dims, so any out_l is legal).
    out_specs = [pl.BlockSpec((tm, out_last), lambda i: (i, 0))]
    out_shape = [jax.ShapeDtypeStruct((B, out_last), jnp.float32)]
    for l in range(num_layers):
        for _ in range(2):                                # psum, psumsq
            out_specs.append(
                pl.BlockSpec((1, 1, dims[l + 1]), lambda i: (i, 0, 0)))
            out_shape.append(
                jax.ShapeDtypeStruct((n_tiles, 1, dims[l + 1]), jnp.float32))

    # Explicit VMEM budget: resident weights/biases (x buffer count) +
    # pipelined x/act tiles + partial outputs + body temporaries, with
    # headroom; capped below v7x's 64 MiB physical VMEM.
    w_bytes = sum(int(w.size) * jnp.dtype(w.dtype).itemsize for w in weights_t)
    b_bytes = sum(int(b.size) * 4 for b in biases)
    bufs = 1 if single_buffer_weights else 2
    est = (w_bytes + b_bytes) * bufs
    est += 2 * (tm * in_dim + tm * out_last) * 4          # x / act tiles
    est += 2 * 2 * sum(out_dims) * 4                      # partial outputs
    est += 6 * tm * max(out_dims + (in_dim,)) * 4         # z, z*z, h temps
    vmem_limit = int(min(max(int(est * 1.5) + (2 << 20), 32 << 20), 56 << 20))
    # TODO(synk): add an out_features-tiled spill path for weight sets that do
    # not fit v7x's 64 MiB VMEM instead of requiring full weight residency.

    results = pl.pallas_call(
        _make_kernel(num_layers),
        grid=(n_tiles,),
        in_specs=in_specs,
        out_specs=tuple(out_specs),
        out_shape=tuple(out_shape),
        compiler_params=pltpu.CompilerParams(
            # Tiles are fully independent (metrics leave the kernel as
            # per-tile partials) -> batch axis is parallel (v7x dual-TC).
            dimension_semantics=("parallel",),
            vmem_limit_bytes=vmem_limit,
        ),
    )(x, *[t for pair in zip(weights_t, biases) for t in pair])

    act = results[0]
    partials = results[1:]

    # Finalize metrics in the wrapper (tiny): Chan-style combine of per-tile
    # statistics for the population variance, clamped at 0 against f32
    # cancellation; msl == E[z^2].
    var_l, msl_l = [], []
    for l in range(num_layers):
        out_l = out_dims[l]
        ps = partials[2 * l].reshape(n_tiles, out_l).sum(axis=1)      # sum z
        pq = partials[2 * l + 1].reshape(n_tiles, out_l).sum(axis=1)  # sum z^2
        n_t = float(tm * out_l)
        n_total = float(B * out_l)
        mean_t = ps / n_t
        m2_t = jnp.maximum(pq - ps * mean_t, 0.0)         # per-tile sum (z-m_t)^2
        gmean = jnp.sum(ps) / n_total
        var = (jnp.sum(m2_t) + n_t * jnp.sum((mean_t - gmean) ** 2)) / n_total
        var_l.append(jnp.maximum(var, 0.0))
        msl_l.append(jnp.sum(pq) / n_total)               # E[z^2]
    return act, jnp.stack(var_l), jnp.stack(msl_l)


def init_vanilla_net_params(key, input_dim, hidden_dims, output_dim,
                            compute_dtype=jnp.bfloat16):
    """he_normal init (kaiming_normal_, relu, fan_in) + zero bias.  Weights
    are pre-transposed ONCE to [in, out] (lane-dense along out_features) and
    cast to compute_dtype (bf16 by default; float32 recovers exact module
    numerics)."""
    dims = [input_dim] + list(hidden_dims) + [output_dim]
    weights_t, biases = [], []
    for l in range(len(dims) - 1):
        key, sub = jax.random.split(key)
        fan_in, fan_out = dims[l], dims[l + 1]
        std = (2.0 / fan_in) ** 0.5
        w = std * jax.random.normal(sub, (fan_out, fan_in), jnp.float32)
        weights_t.append(jnp.asarray(w.T, dtype=compute_dtype))      # [in, out]
        biases.append(jnp.zeros((1, fan_out), jnp.float32))
    return weights_t, biases


def _reference(x, weights_t, biases):
    """Pure-JAX reference mirroring the kernel's numerics (matmul operands in
    the weight dtype, f32 accumulation; bias add / metrics / ReLU in f32)."""
    h = x
    var_l, msl_l = [], []
    for w, b in zip(weights_t, biases):
        z = jnp.dot(h.astype(w.dtype), w,
                    preferred_element_type=jnp.float32) + b
        msl_l.append(jnp.mean(jnp.sum(z * z, axis=1) / z.shape[1]))
        var_l.append(jnp.var(z))                          # population variance
        h = jnp.maximum(z, 0.0)
    return h, jnp.stack(var_l), jnp.stack(msl_l)


if __name__ == "__main__":
    # Small, MXU/lane-friendly shapes: batch 512 (two 256-row tiles),
    # input_dim=32, hidden_dims=[128, 128], output_dim=128.
    B, INPUT_DIM, HIDDEN_DIMS, OUTPUT_DIM = 512, 32, [128, 128], 128

    key = jax.random.PRNGKey(0)
    kp, kx = jax.random.split(key)
    weights_t, biases = init_vanilla_net_params(kp, INPUT_DIM, HIDDEN_DIMS,
                                                OUTPUT_DIM)
    x = jax.random.normal(kx, (B, INPUT_DIM), jnp.float32)

    fwd = jax.jit(functools.partial(vanilla_net_forward, tm=256))
    a, var, msl = fwd(x, weights_t, biases)
    a = jax.block_until_ready(a)

    a_ref, var_ref, msl_ref = _reference(x, weights_t, biases)
    assert jnp.allclose(a, a_ref, atol=1e-3, rtol=1e-3), "activation mismatch"
    assert jnp.allclose(msl, msl_ref, atol=1e-3, rtol=1e-3), "msl mismatch"
    assert jnp.allclose(var, var_ref, atol=1e-3, rtol=1e-3), "variance mismatch"

    print("KERNEL_OK")
</pallas_src>

<mosaic_0001>
module attributes {stable_mosaic.version = 11 : i64} {
  func.func @kernel(%arg0: i32, %arg1: memref<256x32xf32, #tpu.memory_space<vmem>>, %arg2: memref<32x128xbf16, #tpu.memory_space<vmem>>, %arg3: memref<1x128xf32, #tpu.memory_space<vmem>>, %arg4: memref<128x128xbf16, #tpu.memory_space<vmem>>, %arg5: memref<1x128xf32, #tpu.memory_space<vmem>>, %arg6: memref<128x128xbf16, #tpu.memory_space<vmem>>, %arg7: memref<1x128xf32, #tpu.memory_space<vmem>>, %arg8: memref<256x128xf32, #tpu.memory_space<vmem>>, %arg9: memref<1x1x128xf32, #tpu.memory_space<vmem>>, %arg10: memref<1x1x128xf32, #tpu.memory_space<vmem>>, %arg11: memref<1x1x128xf32, #tpu.memory_space<vmem>>, %arg12: memref<1x1x128xf32, #tpu.memory_space<vmem>>, %arg13: memref<1x1x128xf32, #tpu.memory_space<vmem>>, %arg14: memref<1x1x128xf32, #tpu.memory_space<vmem>>) attributes {dimension_semantics = [#tpu.dimension_semantics<parallel>], iteration_bounds = array<i64: 2>, scalar_prefetch = 0 : i64, scratch_operands = 0 : i64, tpu.core_type = #tpu.core_type<tc>, window_params = [{transform_indices = @transform_0, window_bounds = array<i64: 256, 32>}, {pipeline_mode = #tpu.pipeline_mode<synchronous>, transform_indices = @transform_1, window_bounds = array<i64: 32, 128>}, {pipeline_mode = #tpu.pipeline_mode<synchronous>, transform_indices = @transform_2, window_bounds = array<i64: 1, 128>}, {pipeline_mode = #tpu.pipeline_mode<synchronous>, transform_indices = @transform_3, window_bounds = array<i64: 128, 128>}, {pipeline_mode = #tpu.pipeline_mode<synchronous>, transform_indices = @transform_4, window_bounds = array<i64: 1, 128>}, {pipeline_mode = #tpu.pipeline_mode<synchronous>, transform_indices = @transform_5, window_bounds = array<i64: 128, 128>}, {pipeline_mode = #tpu.pipeline_mode<synchronous>, transform_indices = @transform_6, window_bounds = array<i64: 1, 128>}, {transform_indices = @transform_7, window_bounds = array<i64: 256, 128>}, {transform_indices = @transform_8, window_bounds = array<i64: 1, 1, 128>}, {transform_indices = @transform_9, window_bounds = array<i64: 1, 1, 128>}, {transform_indices = @transform_10, window_bounds = array<i64: 1, 1, 128>}, {transform_indices = @transform_11, window_bounds = array<i64: 1, 1, 128>}, {transform_indices = @transform_12, window_bounds = array<i64: 1, 1, 128>}, {transform_indices = @transform_13, window_bounds = array<i64: 1, 1, 128>}]} {
    %c0 = arith.constant 0 : index
    %c0_0 = arith.constant 0 : index
    %0 = vector.load %arg1[%c0, %c0_0] : memref<256x32xf32, #tpu.memory_space<vmem>>, vector<256x32xf32>
    %c0_1 = arith.constant 0 : index
    %c0_2 = arith.constant 0 : index
    %1 = vector.load %arg2[%c0_1, %c0_2] : memref<32x128xbf16, #tpu.memory_space<vmem>>, vector<32x128xbf16>
    %c0_3 = arith.constant 0 : index
    %c0_4 = arith.constant 0 : index
    %2 = vector.load %arg3[%c0_3, %c0_4] : memref<1x128xf32, #tpu.memory_space<vmem>>, vector<1x128xf32>
    %3 = arith.truncf %0 : vector<256x32xf32> to vector<256x32xbf16>
    %cst = arith.constant dense<0.000000e+00> : vector<256x128xf32>
    %4 = tpu.matmul %3, %1, %cst {dimension_numbers = #tpu.dot_dimension_numbers<[1], [0], [0], [1], [0, 0, 1, 1], [], []>} : vector<256x32xbf16>, vector<32x128xbf16>, vector<256x128xf32> -> vector<256x128xf32>
    %5 = vector.broadcast %2 : vector<1x128xf32> to vector<256x128xf32>
    %6 = arith.addf %4, %5 : vector<256x128xf32>
    %cst_5 = arith.constant dense<0.000000e+00> : vector<128xf32>
    %7 = vector.multi_reduction <add>, %6, %cst_5 [0] : vector<256x128xf32> to vector<128xf32>
    %8 = vector.shape_cast %7 : vector<128xf32> to vector<1x128xf32>
    %c0_6 = arith.constant 0 : index
    %c0_7 = arith.constant 0 : index
    %c0_8 = arith.constant 0 : index
    %9 = vector.load %arg9[%c0_6, %c0_7, %c0_8] : memref<1x1x128xf32, #tpu.memory_space<vmem>>, vector<1x1x128xf32>
    %10 = vector.shape_cast %9 : vector<1x1x128xf32> to vector<1x128xf32>
    %11 = vector.shape_cast %8 : vector<1x128xf32> to vector<1x1x128xf32>
    tpu.vector_store %arg9[%c0_6, %c0_7, %c0_8], %11 {strides = array<i32>} : memref<1x1x128xf32, #tpu.memory_space<vmem>>, vector<1x1x128xf32>,
    %12 = arith.mulf %6, %6 : vector<256x128xf32>
    %cst_9 = arith.constant dense<0.000000e+00> : vector<128xf32>
    %13 = vector.multi_reduction <add>, %12, %cst_9 [0] : vector<256x128xf32> to vector<128xf32>
    %14 = vector.shape_cast %13 : vector<128xf32> to vector<1x128xf32>
    %c0_10 = arith.constant 0 : index
    %c0_11 = arith.constant 0 : index
    %c0_12 = arith.constant 0 : index
    %15 = vector.load %arg10[%c0_10, %c0_11, %c0_12] : memref<1x1x128xf32, #tpu.memory_space<vmem>>, vector<1x1x128xf32>
    %16 = vector.shape_cast %15 : vector<1x1x128xf32> to vector<1x128xf32>
    %17 = vector.shape_cast %14 : vector<1x128xf32> to vector<1x1x128xf32>
    tpu.vector_store %arg10[%c0_10, %c0_11, %c0_12], %17 {strides = array<i32>} : memref<1x1x128xf32, #tpu.memory_space<vmem>>, vector<1x1x128xf32>,
    %cst_13 = arith.constant 0.000000e+00 : f32
    %18 = vector.broadcast %cst_13 : f32 to vector<256x128xf32>
    %19 = arith.maximumf %6, %18 : vector<256x128xf32>
    %c0_14 = arith.constant 0 : index
    %c0_15 = arith.constant 0 : index
    %20 = vector.load %arg4[%c0_14, %c0_15] : memref<128x128xbf16, #tpu.memory_space<vmem>>, vector<128x128xbf16>
    %c0_16 = arith.constant 0 : index
    %c0_17 = arith.constant 0 : index
    %21 = vector.load %arg5[%c0_16, %c0_17] : memref<1x128xf32, #tpu.memory_space<vmem>>, vector<1x128xf32>
    %22 = arith.truncf %19 : vector<256x128xf32> to vector<256x128xbf16>
    %cst_18 = arith.constant dense<0.000000e+00> : vector<256x128xf32>
    %23 = tpu.matmul %22, %20, %cst_18 {dimension_numbers = #tpu.dot_dimension_numbers<[1], [0], [0], [1], [0, 0, 1, 1], [], []>} : vector<256x128xbf16>, vector<128x128xbf16>, vector<256x128xf32> -> vector<256x128xf32>
    %24 = vector.broadcast %21 : vector<1x128xf32> to vector<256x128xf32>
    %25 = arith.addf %23, %24 : vector<256x128xf32>
    %cst_19 = arith.constant dense<0.000000e+00> : vector<128xf32>
    %26 = vector.multi_reduction <add>, %25, %cst_19 [0] : vector<256x128xf32> to vector<128xf32>
    %27 = vector.shape_cast %26 : vector<128xf32> to vector<1x128xf32>
    %c0_20 = arith.constant 0 : index
    %c0_21 = arith.constant 0 : index
    %c0_22 = arith.constant 0 : index
    %28 = vector.load %arg11[%c0_20, %c0_21, %c0_22] : memref<1x1x128xf32, #tpu.memory_space<vmem>>, vector<1x1x128xf32>
    %29 = vector.shape_cast %28 : vector<1x1x128xf32> to vector<1x128xf32>
    %30 = vector.shape_cast %27 : vector<1x128xf32> to vector<1x1x128xf32>
    tpu.vector_store %arg11[%c0_20, %c0_21, %c0_22], %30 {strides = array<i32>} : memref<1x1x128xf32, #tpu.memory_space<vmem>>, vector<1x1x128xf32>,
    %31 = arith.mulf %25, %25 : vector<256x128xf32>
    %cst_23 = arith.constant dense<0.000000e+00> : vector<128xf32>
    %32 = vector.multi_reduction <add>, %31, %cst_23 [0] : vector<256x128xf32> to vector<128xf32>
    %33 = vector.shape_cast %32 : vector<128xf32> to vector<1x128xf32>
    %c0_24 = arith.constant 0 : index
    %c0_25 = arith.constant 0 : index
    %c0_26 = arith.constant 0 : index
    %34 = vector.load %arg12[%c0_24, %c0_25, %c0_26] : memref<1x1x128xf32, #tpu.memory_space<vmem>>, vector<1x1x128xf32>
    %35 = vector.shape_cast %34 : vector<1x1x128xf32> to vector<1x128xf32>
    %36 = vector.shape_cast %33 : vector<1x128xf32> to vector<1x1x128xf32>
    tpu.vector_store %arg12[%c0_24, %c0_25, %c0_26], %36 {strides = array<i32>} : memref<1x1x128xf32, #tpu.memory_space<vmem>>, vector<1x1x128xf32>,
    %cst_27 = arith.constant 0.000000e+00 : f32
    %37 = vector.broadcast %cst_27 : f32 to vector<256x128xf32>
    %38 = arith.maximumf %25, %37 : vector<256x128xf32>
    %c0_28 = arith.constant 0 : index
    %c0_29 = arith.constant 0 : index
    %39 = vector.load %arg6[%c0_28, %c0_29] : memref<128x128xbf16, #tpu.memory_space<vmem>>, vector<128x128xbf16>
    %c0_30 = arith.constant 0 : index
    %c0_31 = arith.constant 0 : index
    %40 = vector.load %arg7[%c0_30, %c0_31] : memref<1x128xf32, #tpu.memory_space<vmem>>, vector<1x128xf32>
    %41 = arith.truncf %38 : vector<256x128xf32> to vector<256x128xbf16>
    %cst_32 = arith.constant dense<0.000000e+00> : vector<256x128xf32>
    %42 = tpu.matmul %41, %39, %cst_32 {dimension_numbers = #tpu.dot_dimension_numbers<[1], [0], [0], [1], [0, 0, 1, 1], [], []>} : vector<256x128xbf16>, vector<128x128xbf16>, vector<256x128xf32> -> vector<256x128xf32>
    %43 = vector.broadcast %40 : vector<1x128xf32> to vector<256x128xf32>
    %44 = arith.addf %42, %43 : vector<256x128xf32>
    %cst_33 = arith.constant dense<0.000000e+00> : vector<128xf32>
    %45 = vector.multi_reduction <add>, %44, %cst_33 [0] : vector<256x128xf32> to vector<128xf32>
    %46 = vector.shape_cast %45 : vector<128xf32> to vector<1x128xf32>
    %c0_34 = arith.constant 0 : index
    %c0_35 = arith.constant 0 : index
    %c0_36 = arith.constant 0 : index
    %47 = vector.load %arg13[%c0_34, %c0_35, %c0_36] : memref<1x1x128xf32, #tpu.memory_space<vmem>>, vector<1x1x128xf32>
    %48 = vector.shape_cast %47 : vector<1x1x128xf32> to vector<1x128xf32>
    %49 = vector.shape_cast %46 : vector<1x128xf32> to vector<1x1x128xf32>
    tpu.vector_store %arg13[%c0_34, %c0_35, %c0_36], %49 {strides = array<i32>} : memref<1x1x128xf32, #tpu.memory_space<vmem>>, vector<1x1x128xf32>,
    %50 = arith.mulf %44, %44 : vector<256x128xf32>
    %cst_37 = arith.constant dense<0.000000e+00> : vector<128xf32>
    %51 = vector.multi_reduction <add>, %50, %cst_37 [0] : vector<256x128xf32> to vector<128xf32>
    %52 = vector.shape_cast %51 : vector<128xf32> to vector<1x128xf32>
    %c0_38 = arith.constant 0 : index
    %c0_39 = arith.constant 0 : index
    %c0_40 = arith.constant 0 : index
    %53 = vector.load %arg14[%c0_38, %c0_39, %c0_40] : memref<1x1x128xf32, #tpu.memory_space<vmem>>, vector<1x1x128xf32>
    %54 = vector.shape_cast %53 : vector<1x1x128xf32> to vector<1x128xf32>
    %55 = vector.shape_cast %52 : vector<1x128xf32> to vector<1x1x128xf32>
    tpu.vector_store %arg14[%c0_38, %c0_39, %c0_40], %55 {strides = array<i32>} : memref<1x1x128xf32, #tpu.memory_space<vmem>>, vector<1x1x128xf32>,
    %cst_41 = arith.constant 0.000000e+00 : f32
    %56 = vector.broadcast %cst_41 : f32 to vector<256x128xf32>
    %57 = arith.maximumf %44, %56 : vector<256x128xf32>
    %c0_42 = arith.constant 0 : index
    %c0_43 = arith.constant 0 : index
    %58 = vector.load %arg8[%c0_42, %c0_43] : memref<256x128xf32, #tpu.memory_space<vmem>>, vector<256x128xf32>
    tpu.vector_store %arg8[%c0_42, %c0_43], %57 {strides = array<i32>} : memref<256x128xf32, #tpu.memory_space<vmem>>, vector<256x128xf32>,
    return
  }
  func.func @transform_0(%arg0: i32) -> (i32, i32) {
    %c0_i32 = arith.constant 0 : i32
    %c0_i32_0 = arith.constant 0 : i32
    return %arg0, %c0_i32 : i32, i32
  }
  func.func @transform_1(%arg0: i32) -> (i32, i32) {
    %c0_i32 = arith.constant 0 : i32
    %c0_i32_0 = arith.constant 0 : i32
    %c0_i32_1 = arith.constant 0 : i32
    return %c0_i32, %c0_i32_0 : i32, i32
  }
  func.func @transform_2(%arg0: i32) -> (i32, i32) {
    %c0_i32 = arith.constant 0 : i32
    %c0_i32_0 = arith.constant 0 : i32
    %c0_i32_1 = arith.constant 0 : i32
    return %c0_i32, %c0_i32_0 : i32, i32
  }
  func.func @transform_3(%arg0: i32) -> (i32, i32) {
    %c0_i32 = arith.constant 0 : i32
    %c0_i32_0 = arith.constant 0 : i32
    %c0_i32_1 = arith.constant 0 : i32
    return %c0_i32, %c0_i32_0 : i32, i32
  }
  func.func @transform_4(%arg0: i32) -> (i32, i32) {
    %c0_i32 = arith.constant 0 : i32
    %c0_i32_0 = arith.constant 0 : i32
    %c0_i32_1 = arith.constant 0 : i32
    return %c0_i32, %c0_i32_0 : i32, i32
  }
  func.func @transform_5(%arg0: i32) -> (i32, i32) {
    %c0_i32 = arith.constant 0 : i32
    %c0_i32_0 = arith.constant 0 : i32
    %c0_i32_1 = arith.constant 0 : i32
    return %c0_i32, %c0_i32_0 : i32, i32
  }
  func.func @transform_6(%arg0: i32) -> (i32, i32) {
    %c0_i32 = arith.constant 0 : i32
    %c0_i32_0 = arith.constant 0 : i32
    %c0_i32_1 = arith.constant 0 : i32
    return %c0_i32, %c0_i32_0 : i32, i32
  }
  func.func @transform_7(%arg0: i32) -> (i32, i32) {
    %c0_i32 = arith.constant 0 : i32
    %c0_i32_0 = arith.constant 0 : i32
    return %arg0, %c0_i32 : i32, i32
  }
  func.func @transform_8(%arg0: i32) -> (i32, i32, i32) {
    %c0_i32 = arith.constant 0 : i32
    %c0_i32_0 = arith.constant 0 : i32
    %c0_i32_1 = arith.constant 0 : i32
    return %arg0, %c0_i32, %c0_i32_0 : i32, i32, i32
  }
  func.func @transform_9(%arg0: i32) -> (i32, i32, i32) {
    %c0_i32 = arith.constant 0 : i32
    %c0_i32_0 = arith.constant 0 : i32
    %c0_i32_1 = arith.constant 0 : i32
    return %arg0, %c0_i32, %c0_i32_0 : i32, i32, i32
  }
  func.func @transform_10(%arg0: i32) -> (i32, i32, i32) {
    %c0_i32 = arith.constant 0 : i32
    %c0_i32_0 = arith.constant 0 : i32
    %c0_i32_1 = arith.constant 0 : i32
    return %arg0, %c0_i32, %c0_i32_0 : i32, i32, i32
  }
  func.func @transform_11(%arg0: i32) -> (i32, i32, i32) {
    %c0_i32 = arith.constant 0 : i32
    %c0_i32_0 = arith.constant 0 : i32
    %c0_i32_1 = arith.constant 0 : i32
    return %arg0, %c0_i32, %c0_i32_0 : i32, i32, i32
  }
  func.func @transform_12(%arg0: i32) -> (i32, i32, i32) {
    %c0_i32 = arith.constant 0 : i32
    %c0_i32_0 = arith.constant 0 : i32
    %c0_i32_1 = arith.constant 0 : i32
    return %arg0, %c0_i32, %c0_i32_0 : i32, i32, i32
  }
  func.func @transform_13(%arg0: i32) -> (i32, i32, i32) {
    %c0_i32 = arith.constant 0 : i32
    %c0_i32_0 = arith.constant 0 : i32
    %c0_i32_1 = arith.constant 0 : i32
    return %arg0, %c0_i32, %c0_i32_0 : i32, i32, i32
  }
}

</mosaic_0001>

<bundles_post_ra>
// kernel: vanilla_net_forward.1
= control target key start
LH: loop header
LB: loop body
LE: loop exit
PB: predicated region body
PF: predicated region fallthrough
CT: control target
= control target key end

     0   :  { %s2866_s0 = inlined_call_operand.vmem [shape: f32[512,32], index: 0, kind: input, shape index: {}]   ;;  %s2867_s1 = inlined_call_operand.vmem [shape: bf16[32,128], index: 1, kind: input, shape index: {}]   ;;  %s2868_s2 = inlined_call_operand.vmem [shape: f32[1,128], index: 2, kind: input, shape index: {}]   ;;  %s2869_s3 = inlined_call_operand.vmem [shape: bf16[128,128], index: 3, kind: input, shape index: {}]   ;;  %s2870_s4 = inlined_call_operand.vmem [shape: f32[1,128], index: 4, kind: input, shape index: {}]   ;;  %s2871_s5 = inlined_call_operand.vmem [shape: bf16[128,128], index: 5, kind: input, shape index: {}]   ;;  %s2872_s6 = inlined_call_operand.vmem [shape: f32[1,128], index: 6, kind: input, shape index: {}]   ;;  %s2873_s7 = inlined_call_operand.hbm [shape: f32[512,128], index: 7, kind: output, shape index: {0}]   ;;  %s2874_s8 = inlined_call_operand.vmem [shape: f32[2,1,128], index: 8, kind: output, shape index: {1}]   ;;  %s2875_s9 = inlined_call_operand.vmem [shape: f32[2,1,128], index: 9, kind: output, shape index: {2}]   ;;  %s2876_s10 = inlined_call_operand.vmem [shape: f32[2,1,128], index: 10, kind: output, shape index: {3}]   ;;  %s2877_s11 = inlined_call_operand.vmem [shape: f32[2,1,128], index: 11, kind: output, shape index: {4}]   ;;  %s2878_s12 = inlined_call_operand.vmem [shape: f32[2,1,128], index: 12, kind: output, shape index: {5}]   ;;  %s2879_s13 = inlined_call_operand.vmem [shape: f32[2,1,128], index: 13, kind: output, shape index: {6}]  }
   0x1   :  { %2880 = sst [smem:[#allocation6_spill]] %s2866_s0 }
   0x2   :  { %2881 = sst [smem:[#allocation7_spill]] %s2867_s1 }
   0x3   :  { %19 = vsyncpa [#allocation3], 0 }
   0x4   :  { %21 = vsyncpa [#allocation3 + $0x1], 0  ;;  %s2395_s25 = smov 0   ;;  %s2397_s26 = smov 0  }
   0x5   :  { %s2399_s27 = smov 0   ;;  %s2401_s28 = smov 0  }
   0x6 LB: > { %s2416_s29 = sadd.s32 4294967295, %s2320_s28   ;;  %s1947_s30 = sadd.s32 4294967294, %s2320_s28   ;;  %s2320_s28 = sphi %s2401_s28, %s2891_s28   ;;  %s2316_s27 = sphi %s2399_s27, %s2890_s27   ;;  %s2312_s26 = sphi %s2397_s26, %s2889_s26   ;;  %s2308_s25 = sphi %s2395_s25, %s2888_s25  }
   0x7   : > { %s2420_s14 = sadd.s32 1, %s2320_s28   ;;  %s186_s15 = sadd.s32 1, %s2316_s27 }
   0x8   : > { %s183_s16 = ssub.s32 %s2320_s28, %s2420_s14  ;;  %p196_p0 = scmp.ne.s32.totalorder %s2316_s27, %s2312_s26 }
   0x9   : > { %p184_p1 = scmp.eq.s32.totalorder %s183_s16, 0  ;;  %p197_p2 = scmp.eq.s32.totalorder %s2416_s29, 1 }
   0xa   : > { %p202_p3 = scmp.ne.s32.totalorder %s2312_s26, %s2308_s25  ;;  %p203_p4 = scmp.eq.s32.totalorder %s1947_s30, 1 }
   0xb   : > { %s2431_s17 = scalar_select %p184_p1, %s2316_s27, %s186_s15  }
   0xc   : > { %p2433_p5 = por %p197_p2, %p196_p0  ;;  %p2437_p6 = por %p203_p4, %p202_p3 }
   0xd   : > { %2882 = sst [smem:[#allocation5_spill]] %s2431_s17  ;;  %p1950_p7 = scmp.ge.s32.totalorder %s2320_s28, 1 }
   0xe   : > { %p404_p8 = scmp.lt.s32.totalorder %s2320_s28, 3 }
  0x10   : > { %p405_p9 = pnand %p1950_p7, %p404_p8 }
  0x11   : > { %s2885_s1 = sld [smem:[#allocation7_spill]] (!%p405_p9)  ;;  %s1952_s22 = sshll.u32 (!%p405_p9), %s2416_s29, 5  ;;  %v2242_v2 = vld [vmem:[%s2869_s3] sm:$0xff] (!%p405_p9)   ;;  %vm563_vm0 = vcmask (!%p405_p9), 261120   ;;  %v2243_v24 = vld [vmem:[%s2869_s3 + $0x8] sm:$0xff] (!%p405_p9)   ;;  %v2244_v29 = vld [vmem:[%s2869_s3 + $0x10] sm:$0xff] (!%p405_p9)  }
  0x12   : > { %408 = sbr.rel (%p405_p9) target bundleno = 782 (0x30e), region = 48  ;;  %p467_p10 = scmp.lt.s32.totalorder (!%p405_p9), %s1952_s22, 63  ;;  %v2245_v38 = vld [vmem:[%s2869_s3 + $0x18] sm:$0xff] (!%p405_p9)   ;;  %v2246_v46 = vld [vmem:[%s2869_s3 + $0x20] sm:$0xff] (!%p405_p9)   ;;  %v2247_v51 = vld [vmem:[%s2869_s3 + $0x28] sm:$0xff] (!%p405_p9)  }
  0x13   : > { %s2886_s0 = sld [smem:[#allocation6_spill]] (!%p405_p9)  ;;  %v2248_v56 = vld [vmem:[%s2869_s3 + $0x30] sm:$0xff] (!%p405_p9)   ;;  %v2249_v57 = vld [vmem:[%s2869_s3 + $0x38] sm:$0xff] (!%p405_p9)   ;;  %v2250_v58 = vld [vmem:[%s2871_s5] sm:$0xff] (!%p405_p9)   ;;  %p473_p11 = scmp.lt.s32.totalorder (!%p405_p9), %s2416_s29, 1 }
  0x14   : > { %v2251_v59 = vld [vmem:[%s2871_s5 + $0x8] sm:$0xff] (!%p405_p9)   ;;  %v2252_v60 = vld [vmem:[%s2871_s5 + $0x10] sm:$0xff] (!%p405_p9)   ;;  %v2253_v61 = vld [vmem:[%s2871_s5 + $0x18] sm:$0xff] (!%p405_p9)   ;;  %s2322_s30 = smov (!%p405_p9), [#allocation2]  }
  0x15   : > { %v2254_v62 = vld [vmem:[%s2871_s5 + $0x20] sm:$0xff] (!%p405_p9)   ;;  %v2255_v63 = vld [vmem:[%s2871_s5 + $0x28] sm:$0xff] (!%p405_p9)  }
  0x17   : > { %v2240_v0 = vld [vmem:[%s2885_s1] sm:$0xff] (!%p405_p9)   ;;  %v2241_v1 = vld [vmem:[%s2885_s1 + $0x8] sm:$0xff] (!%p405_p9)   ;;  %s1996_s1 = sshll.u32 (!%p405_p9), %s2416_s29, 12 }
  0x18   : > { %2063 = vmatprep.subr.bf16.mxu0 (!%p405_p9), %v2240_v0  ;;  %2195 = vmatprep.subr.bf16.mxu1 (!%p405_p9), %v2240_v0  ;;  %s2808_s20 = scalar_lea.hbm (!%p405_p9), %s2873_s7, %s1996_s1 }
  0x19   : > { %2064 = vmatpush3.bf16.msra.mxu0 %v2240_v0  ;;  %s2893_s22 = smov (!%p467_p10, %s1952_s22), 63  ;;  %2197 = vmatpush3.bf16.msra.mxu1 %v2240_v0  ;;  %v2548_v0 = vld [vmem:[%s2868_s2] ss:$0 sm:$0xff] }
  0x1a   : > { %2065 = vmatprep.subr.bf16.mxu0 %v2241_v1  ;;  %2196 = vmatprep.subr.bf16.mxu1 %v2241_v1  ;;  %s1953_s16 = sshll.u32 %s2893_s22, 3  ;;  %s433_s22 = sand.u32 1, %s2312_s26  }
  0x1b   : > { %s2456_s17 = scalar_lea.vmem %s2886_s0, %s1953_s16  ;;  %s1951_s15 = sshll.u32 %s433_s22, 8 }
  0x1c   : > { %v492_v3 = vld [vmem:[%s2456_s17] sm:$0xff]  ;;  %v493_v4 = vld [vmem:[%s2456_s17 + $0x8] sm:$0xff]  ;;  %v494_v5 = vld [vmem:[%s2456_s17 + $0x10] sm:$0xff]  ;;  %s2671_s24 = scalar_select %p473_p11, %s2416_s29, 1 }
  0x1d   : > { %2066 = vmatpush3.bf16.msra.mxu0 %v2241_v1  ;;  %2198 = vmatpush3.bf16.msra.mxu1 %v2241_v1  ;;  %v529_v6 = vpack.c.bf16 %v493_v4, %v492_v3  ;;  %v495_v7 = vld [vmem:[%s2456_s17 + $0x18] sm:$0xff]  ;;  %v496_v8 = vld [vmem:[%s2456_s17 + $0x20] sm:$0xff]  ;;  %v497_v9 = vld [vmem:[%s2456_s17 + $0x28] sm:$0xff]  ;;  %s2744_s0 = scalar_lea.vmem [#allocation2], %s1951_s15  ;;  %s2262_s15 = sshll.u32 %s2322_s30, 4  ;;  %s2263_s15 = int_to_ptr.vmem [resolvable:$false] %s2262_s15 }
  0x1e   : > { %2099 = vmatprep.subr.bf16.mxu1 %v2242_v2  ;;  %v530_v10 = vpack.c.bf16 %v495_v7, %v494_v5  ;;  %v531_v11 = vpack.c.bf16 %v497_v9, %v496_v8  ;;  %v498_v12 = vld [vmem:[%s2456_s17 + $0x30] sm:$0xff]  ;;  %v499_v13 = vld [vmem:[%s2456_s17 + $0x38] sm:$0xff]  ;;  %v500_v14 = vld [vmem:[%s2456_s17 + $0x40] sm:$0xff]  ;;  %2147 = vmatprep.subr.bf16.mxu0 %v2250_v58  ;;  %s475_s16 = scalar_lea.vmem %s2874_s8, %s2671_s24  ;;  %s478_s21 = scalar_lea.vmem %s2875_s9, %s2671_s24 }
  0x1f   : > { %2067 = vmatprep.mubr.msk.bf16.mxu0 %vm563_vm0, %v529_v6  ;;  %v501_v15 = vld [vmem:[%s2456_s17 + $0x48] sm:$0xff]  ;;  %v508_v16 = vld [vmem:[%s2456_s17 + $0x80] sm:$0xff]  ;;  %v510_v19 = vld [vmem:[%s2456_s17 + $0x90] sm:$0xff]  ;;  %v532_v25 = vpack.c.bf16 %v499_v13, %v498_v12  ;;  %s2264_s1 = scalar_lea.vmem %s2263_s15, 8192 }
  0x20   : > { %2068 = vmatmul.mubr.msk.bf16.vlgmr.msra.gmra.mrb[0].mxu0 %vm563_vm0, %v530_v10  ;;  %v509_v17 = vld [vmem:[%s2456_s17 + $0x88] sm:$0xff]  ;;  %v511_v20 = vld [vmem:[%s2456_s17 + $0x98] sm:$0xff]  ;;  %v512_v21 = vld [vmem:[%s2456_s17 + $0xa0] sm:$0xff]  ;;  %v533_v27 = vpack.c.bf16 %v501_v15, %v500_v14 }
  0x21   : > { %2071 = vmatprep.mubr.msk.bf16.mxu0 %vm563_vm0, %v531_v11  ;;  %v537_v18 = vpack.c.bf16 %v509_v17, %v508_v16  ;;  %v538_v22 = vpack.c.bf16 %v511_v20, %v510_v19  ;;  %v513_v23 = vld [vmem:[%s2456_s17 + $0xa8] sm:$0xff]  ;;  %v514_v28 = vld [vmem:[%s2456_s17 + $0xb0] sm:$0xff]  ;;  %v515_v30 = vld [vmem:[%s2456_s17 + $0xb8] sm:$0xff]  ;;  %2148 = vmatpush3.bf16.msra.mxu0 %v2250_v58 }
  0x22   : > { %v539_v26 = vpack.c.bf16 %v513_v23, %v512_v21  ;;  %v516_v31 = vld [vmem:[%s2456_s17 + $0xc0] sm:$0xff]  ;;  %v502_v32 = vld [vmem:[%s2456_s17 + $0x50] sm:$0xff]  ;;  %v503_v33 = vld [vmem:[%s2456_s17 + $0x58] sm:$0xff]  ;;  %v540_v37 = vpack.c.bf16 %v515_v30, %v514_v28  ;;  %2149 = vmatprep.subr.bf16.mxu0 %v2251_v59 }
  0x23   : > { %2083 = vmatprep.mubr.msk.bf16.mxu1 %vm563_vm0, %v537_v18  ;;  %v517_v34 = vld [vmem:[%s2456_s17 + $0xc8] sm:$0xff]  ;;  %v504_v35 = vld [vmem:[%s2456_s17 + $0x60] sm:$0xff]  ;;  %v534_v40 = vpack.c.bf16 %v503_v33, %v502_v32  ;;  %v518_v42 = vld [vmem:[%s2456_s17 + $0xd0] sm:$0xff] }
  0x24   : > { %2084 = vmatmul.mubr.msk.bf16.vlgmr.msra.gmra.mrb[0].mxu1 %vm563_vm0, %v538_v22  ;;  %v505_v36 = vld [vmem:[%s2456_s17 + $0x68] sm:$0xff]  ;;  %v541_v39 = vpack.c.bf16 %v517_v34, %v516_v31  ;;  %v519_v43 = vld [vmem:[%s2456_s17 + $0xd8] sm:$0xff]  ;;  %v520_v44 = vld [vmem:[%s2456_s17 + $0xe0] sm:$0xff] }
  0x25   : > { %2087 = vmatprep.mubr.msk.bf16.mxu1 %vm563_vm0, %v539_v26  ;;  %2100 = vmatpush3.bf16.msra.mxu1 %v2242_v2  ;;  %v535_v41 = vpack.c.bf16 %v505_v36, %v504_v35  ;;  %v521_v45 = vld [vmem:[%s2456_s17 + $0xe8] sm:$0xff]  ;;  %v506_v47 = vld [vmem:[%s2456_s17 + $0x70] sm:$0xff]  ;;  %v507_v48 = vld [vmem:[%s2456_s17 + $0x78] sm:$0xff]  ;;  %v542_v49 = vpack.c.bf16 %v519_v43, %v518_v42 }
  0x26   : > { %2101 = vmatprep.subr.bf16.mxu1 %v2243_v24  ;;  %v543_v50 = vpack.c.bf16 %v521_v45, %v520_v44  ;;  %v536_v52 = vpack.c.bf16 %v507_v48, %v506_v47  ;;  %v522_v53 = vld [vmem:[%s2456_s17 + $0xf0] sm:$0xff]  ;;  %v523_v54 = vld [vmem:[%s2456_s17 + $0xf8] sm:$0xff]  ;;  %2150 = vmatpush3.bf16.msra.mxu0 %v2251_v59 }
  0x27   : > { %v544_v55 = vpack.c.bf16 %v523_v54, %v522_v53  ;;  %2151 = vmatprep.subr.bf16.mxu0 %v2252_v60 }
  0x28   : > { %2072 = vmatmul.mubr.msk.bf16.gmra.mrb[4].mxu0 %vm563_vm0, %v532_v25 }
  0x29   : > { %2075 = vmatprep.mubr.msk.bf16.mxu0 %vm563_vm0, %v533_v27  ;;  %2102 = vmatpush3.bf16.msra.mxu1 %v2243_v24 }
  0x2a   : > { %2103 = vmatprep.subr.bf16.mxu1 %v2244_v29  ;;  %2152 = vmatpush3.bf16.msra.mxu0 %v2252_v60 }
  0x2b   : > { %2153 = vmatprep.subr.bf16.mxu0 %v2253_v61 }
  0x2c   : > { %2088 = vmatmul.mubr.msk.bf16.gmra.mrb[4].mxu1 %vm563_vm0, %v540_v37 }
  0x2d   : > { %2091 = vmatprep.mubr.msk.bf16.mxu1 %vm563_vm0, %v541_v39  ;;  %2104 = vmatpush3.bf16.msra.mxu1 %v2244_v29 }
  0x2e   : > { %2105 = vmatprep.subr.bf16.mxu1 %v2245_v38  ;;  %2154 = vmatpush3.bf16.msra.mxu0 %v2253_v61 }
  0x2f   : > { %2155 = vmatprep.subr.bf16.mxu0 %v2254_v62 }
  0x30   : > { %2076 = vmatmul.mubr.msk.bf16.gmra.mrb[8].mxu0 %vm563_vm0, %v534_v40 }
  0x31   : > { %2079 = vmatprep.mubr.msk.bf16.mxu0 %vm563_vm0, %v535_v41  ;;  %2106 = vmatpush3.bf16.msra.mxu1 %v2245_v38 }
  0x32   : > { %2107 = vmatprep.subr.bf16.mxu1 %v2246_v46  ;;  %2156 = vmatpush3.bf16.msra.mxu0 %v2254_v62 }
  0x33   : > { %2157 = vmatprep.subr.bf16.mxu0 %v2255_v63 }
  0x34   : > { %2092 = vmatmul.mubr.msk.bf16.gmra.mrb[8].mxu1 %vm563_vm0, %v542_v49 }
  0x35   : > { %2095 = vmatprep.mubr.msk.bf16.mxu1 %vm563_vm0, %v543_v50  ;;  %2108 = vmatpush3.bf16.msra.mxu1 %v2246_v46 }
  0x36   : > { %2109 = vmatprep.subr.bf16.mxu1 %v2247_v51  ;;  %2158 = vmatpush3.bf16.msra.mxu0 %v2255_v63 }
  0x38   : > { %2080 = vmatmul.mubr.msk.bf16.gmra.mrb[12].mxu0 %vm563_vm0, %v536_v52 }
  0x39   : > { %2110 = vmatpush3.bf16.msra.mxu1 %v2247_v51 }
  0x3a   : > { %2111 = vmatprep.subr.bf16.mxu1 %v2248_v56 }
  0x3c   : > { %2096 = vmatmul.mubr.msk.bf16.gmra.mrb[12].mxu1 %vm563_vm0, %v544_v55 }
  0x3d   : > { %2112 = vmatpush3.bf16.msra.mxu1 %v2248_v56 }
  0x3e   : > { %2113 = vmatprep.subr.bf16.mxu1 %v2249_v57 }
  0x41   : > { %2114 = vmatpush3.bf16.msra.mxu1 %v2249_v57 }
  0xf3   : > { %v2069_v1 = vpop.f32.mrb[0].mxu0 }
  0xf4   : > { %v655_v2 = vadd.f32 %v2069_v1, %v2548_v0  ;;  %v646_v3 = vpop.f32.mrb[1].mxu0 }
  0xf5   : > { %v647_v4 = vadd.f32 %v2548_v0, %v646_v3  ;;  %v2070_v5 = vpop.f32.mrb[2].mxu0 }
  0xf6   : > { %v658_v6 = vadd.f32 %v2070_v5, %v2548_v0  ;;  %v649_v7 = vpop.f32.mrb[3].mxu0  ;;  %v883_v9 = vmax.f32 %v655_v2, 0.0  ;;  %v813_v18 = vmul.f32 %v655_v2, %v655_v2 }
  0xf7   : > { %v650_v8 = vadd.f32 %v2548_v0, %v649_v7  ;;  %v811_v10 = vmul.f32 %v647_v4, %v647_v4  ;;  %v2085_v12 = vpop.f32.mrb[0].mxu1  ;;  %v881_v13 = vmax.f32 %v647_v4, 0.0 }
  0xf8   : > { %v884_v11 = vmax.f32 %v658_v6, 0.0  ;;  %v710_v17 = vpop.f32.mrb[1].mxu1  ;;  %v814_v29 = vmul.f32 %v658_v6, %v658_v6  ;;  %v2566_v44 = vadd.f32 %v2085_v12, %v2548_v0 }
  0xf9   : > { %v773_v14 = vadd.f32 %v650_v8, %v647_v4  ;;  %v812_v15 = vmul.f32 %v650_v8, %v650_v8  ;;  %v882_v16 = vmax.f32 %v650_v8, 0.0  ;;  %v2086_v20 = vpop.f32.mrb[2].mxu1  ;;  %v2555_v25 = vadd.f32 %v2548_v0, %v710_v17 }
  0xfa   : > { %v931_v19 = vpack.c.bf16 %v884_v11, %v883_v9  ;;  %v713_v26 = vpop.f32.mrb[3].mxu1  ;;  %v2569_v48 = vadd.f32 %v2086_v20, %v2548_v0  ;;  %v899_v5 = vmax.f32 %v2566_v44, 0.0 }
  0xfb   : > { %v774_v21 = vadd.f32 %v773_v14, %v655_v2  ;;  %v843_v22 = vadd.f32 %v812_v15, %v811_v10  ;;  %v2073_v23 = vpop.f32.mrb[4].mxu0  ;;  %v930_v24 = vpack.c.bf16 %v882_v16, %v881_v13  ;;  %v2561_v36 = vadd.f32 %v2548_v0, %v713_v26 }
  0xfc   : > { %v671_v27 = vadd.f32 %v2073_v23, %v2548_v0  ;;  %v662_v28 = vpop.f32.mrb[5].mxu0  ;;  %v897_v40 = vmax.f32 %v2555_v25, 0.0  ;;  %v900_v9 = vmax.f32 %v2569_v48, 0.0 }
  0xfd   : > { %v844_v30 = vadd.f32 %v843_v22, %v813_v18  ;;  %v663_v31 = vadd.f32 %v2548_v0, %v662_v28  ;;  %v775_v32 = vadd.f32 %v774_v21, %v658_v6  ;;  %v2074_v33 = vpop.f32.mrb[6].mxu0  ;;  %2115 = vmatprep.mubr.bf16.mxu1 %v930_v24  ;;  %v898_v49 = vmax.f32 %v2561_v36, 0.0 }
  0xfe   : > { %v674_v34 = vadd.f32 %v2074_v33, %v2548_v0  ;;  %v665_v35 = vpop.f32.mrb[7].mxu0  ;;  %2116 = vmatmul.mubr.bf16.vlgmr.msra.gmra.mrb[16].mxu1 %v931_v19  ;;  %v887_v41 = vmax.f32 %v671_v27, 0.0  ;;  %v817_v56 = vmul.f32 %v671_v27, %v671_v27  ;;  %v2591_v28 = vmul.f32 %v2555_v25, %v2555_v25 }
  0xff   : > { %v776_v37 = vadd.f32 %v775_v32, %v663_v31  ;;  %v815_v38 = vmul.f32 %v663_v31, %v663_v31  ;;  %v845_v39 = vadd.f32 %v844_v30, %v814_v29  ;;  %v666_v43 = vadd.f32 %v2548_v0, %v665_v35  ;;  %v2089_v45 = vpop.f32.mrb[4].mxu1 }
 0x100   : > { %v888_v42 = vmax.f32 %v674_v34, 0.0  ;;  %v885_v47 = vmax.f32 %v663_v31, 0.0  ;;  %v726_v50 = vpop.f32.mrb[5].mxu1  ;;  %v2572_v58 = vpack.c.bf16 %v898_v49, %v897_v40  ;;  %v818_v2 = vmul.f32 %v674_v34, %v674_v34 }
 0x101   : > { %v846_v46 = vadd.f32 %v845_v39, %v815_v38  ;;  %v777_v51 = vadd.f32 %v776_v37, %v666_v43  ;;  %v816_v52 = vmul.f32 %v666_v43, %v666_v43  ;;  %v886_v53 = vmax.f32 %v666_v43, 0.0  ;;  %v2090_v55 = vpop.f32.mrb[6].mxu1 }
 0x102   : > { %v933_v54 = vpack.c.bf16 %v888_v42, %v887_v41  ;;  %v729_v59 = vpop.f32.mrb[7].mxu1  ;;  %v2579_v10 = vadd.f32 %v2089_v45, %v2548_v0  ;;  %v2584_v14 = vadd.f32 %v2548_v0, %v726_v50  ;;  %v2587_v18 = vadd.f32 %v2090_v55, %v2548_v0 }
 0x103   : > { %v2077_v57 = vpop.f32.mrb[8].mxu0  ;;  %v778_v60 = vadd.f32 %v777_v51, %v671_v27  ;;  %v847_v61 = vadd.f32 %v846_v46, %v816_v52  ;;  %v932_v1 = vpack.c.bf16 %v886_v53, %v885_v47  ;;  %v2594_v29 = vadd.f32 %v2548_v0, %v729_v59 }
 0x104   : > { %v687_v62 = vadd.f32 %v2077_v57, %v2548_v0  ;;  %v678_v63 = vpop.f32.mrb[9].mxu0  ;;  %v2597_v35 = vpack.c.bf16 %v900_v9, %v899_v5  ;;  %v901_v47 = vmax.f32 %v2584_v14, 0.0  ;;  %v904_v49 = vmax.f32 %v2587_v18, 0.0 }
 0x105   : > { %v679_v3 = vadd.f32 %v2548_v0, %v678_v63  ;;  %v2078_v4 = vpop.f32.mrb[10].mxu0  ;;  %v848_v6 = vadd.f32 %v847_v61, %v817_v56  ;;  %v779_v7 = vadd.f32 %v778_v60, %v674_v34  ;;  %2119 = vmatprep.mubr.bf16.mxu1 %v932_v1  ;;  %v903_v34 = vmax.f32 %v2579_v10, 0.0 }
 0x106   : > { %v681_v8 = vpop.f32.mrb[11].mxu0  ;;  %v690_v12 = vadd.f32 %v2078_v4, %v2548_v0  ;;  %2120 = vmatmul.mubr.bf16.gmra.mrb[20].mxu1 %v933_v54  ;;  %v891_v15 = vmax.f32 %v687_v62, 0.0  ;;  %v821_v38 = vmul.f32 %v687_v62, %v687_v62  ;;  %v902_v53 = vmax.f32 %v2594_v29, 0.0 }
 0x107   : > { %v819_v11 = vmul.f32 %v679_v3, %v679_v3  ;;  %v682_v13 = vadd.f32 %v2548_v0, %v681_v8  ;;  %v780_v16 = vadd.f32 %v779_v7, %v679_v3  ;;  %v849_v17 = vadd.f32 %v848_v6, %v818_v2  ;;  %v2093_v19 = vpop.f32.mrb[8].mxu1 }
 0x108   : > { %v889_v20 = vmax.f32 %v679_v3, 0.0  ;;  %v892_v21 = vmax.f32 %v690_v12, 0.0  ;;  %v742_v24 = vpop.f32.mrb[9].mxu1  ;;  %v822_v43 = vmul.f32 %v690_v12, %v690_v12  ;;  %v2605_v54 = vadd.f32 %v2093_v19, %v2548_v0 }
 0x109   : > { %v820_v22 = vmul.f32 %v682_v13, %v682_v13  ;;  %v890_v23 = vmax.f32 %v682_v13, 0.0  ;;  %v850_v26 = vadd.f32 %v849_v17, %v819_v11  ;;  %v781_v27 = vadd.f32 %v780_v16, %v682_v13  ;;  %v2094_v30 = vpop.f32.mrb[10].mxu1 }
 0x10a   : > { %v935_v33 = vpack.c.bf16 %v892_v21, %v891_v15  ;;  %v745_v37 = vpop.f32.mrb[11].mxu1  ;;  %v2613_v63 = vadd.f32 %v2094_v30, %v2548_v0  ;;  %v907_v11 = vmax.f32 %v2605_v54, 0.0 }
 0x10b   : > { %v2081_v31 = vpop.f32.mrb[12].mxu0  ;;  %v934_v32 = vpack.c.bf16 %v890_v23, %v889_v20  ;;  %v782_v39 = vadd.f32 %v781_v27, %v687_v62  ;;  %v851_v40 = vadd.f32 %v850_v26, %v820_v22  ;;  %v2610_v62 = vadd.f32 %v2548_v0, %v742_v24 }
 0x10c   : > { %v703_v41 = vadd.f32 %v2081_v31, %v2548_v0  ;;  %v694_v42 = vpop.f32.mrb[13].mxu0  ;;  %v908_v17 = vmax.f32 %v2613_v63, 0.0  ;;  %v940_v22 = vpack.c.bf16 %v902_v53, %v901_v47  ;;  %v746_v23 = vadd.f32 %v2548_v0, %v745_v37 }
 0x10d   : > { %v695_v45 = vadd.f32 %v2548_v0, %v694_v42  ;;  %v2082_v46 = vpop.f32.mrb[14].mxu0  ;;  %2123 = vmatprep.mubr.bf16.mxu1 %v934_v32  ;;  %v852_v50 = vadd.f32 %v851_v40, %v821_v38  ;;  %v783_v51 = vadd.f32 %v782_v39, %v690_v12  ;;  %v905_v16 = vmax.f32 %v2610_v62, 0.0 }
 0x10e   : > { %v697_v52 = vpop.f32.mrb[15].mxu0  ;;  %v895_v55 = vmax.f32 %v703_v41, 0.0  ;;  %v706_v57 = vadd.f32 %v2082_v46, %v2548_v0  ;;  %2124 = vmatmul.mubr.bf16.gmra.mrb[24].mxu1 %v935_v33  ;;  %v825_v7 = vmul.f32 %v703_v41, %v703_v41  ;;  %v941_v24 = vpack.c.bf16 %v904_v49, %v903_v34 }
 0x10f   : > { %v823_v56 = vmul.f32 %v695_v45, %v695_v45  ;;  %v698_v59 = vadd.f32 %v2548_v0, %v697_v52  ;;  %v784_v60 = vadd.f32 %v783_v51, %v695_v45  ;;  %v853_v61 = vadd.f32 %v852_v50, %v822_v43  ;;  %v2097_v1 = vpop.f32.mrb[12].mxu1 }
 0x110   : > { %v893_v2 = vmax.f32 %v695_v45, 0.0  ;;  %v896_v3 = vmax.f32 %v706_v57, 0.0  ;;  %v758_v6 = vpop.f32.mrb[13].mxu1  ;;  %v2620_v26 = vadd.f32 %v2097_v1, %v2548_v0  ;;  %v826_v31 = vmul.f32 %v706_v57, %v706_v57 }
 0x111   : > { %v824_v4 = vmul.f32 %v698_v59, %v698_v59  ;;  %v894_v5 = vmax.f32 %v698_v59, 0.0  ;;  %v854_v8 = vadd.f32 %v853_v61, %v823_v56  ;;  %v785_v9 = vadd.f32 %v784_v60, %v698_v59  ;;  %v2098_v12 = vpop.f32.mrb[14].mxu1 }
 0x112   : > { %v937_v15 = vpack.c.bf16 %v896_v3, %v895_v55  ;;  %v761_v19 = vpop.f32.mrb[15].mxu1  ;;  %v759_v27 = vadd.f32 %v2548_v0, %v758_v6  ;;  %v2624_v30 = vadd.f32 %v2098_v12, %v2548_v0  ;;  %v906_v38 = vmax.f32 %v746_v23, 0.0 }
 0x113   : > { %v936_v13 = vpack.c.bf16 %v894_v5, %v893_v2  ;;  %v786_v20 = vadd.f32 %v785_v9, %v703_v41  ;;  %v855_v21 = vadd.f32 %v854_v8, %v824_v4  ;;  %v911_v39 = vmax.f32 %v2620_v26, 0.0 }
 0x114   : > { %v912_v34 = vmax.f32 %v2624_v30, 0.0  ;;  %v909_v41 = vmax.f32 %v759_v27, 0.0  ;;  %v942_v42 = vpack.c.bf16 %v906_v38, %v905_v16  ;;  %v762_v43 = vadd.f32 %v2548_v0, %v761_v19 }
 0x115   : > { %2127 = vmatprep.mubr.bf16.mxu1 %v936_v13  ;;  %v856_v32 = vadd.f32 %v855_v21, %v825_v7  ;;  %v787_v33 = vadd.f32 %v786_v20, %v706_v57  ;;  %v943_v45 = vpack.c.bf16 %v908_v17, %v907_v11  ;;  %v828_v49 = vmul.f32 %v2561_v36, %v2561_v36 }
 0x116   : > { %2128 = vmatmul.mubr.bf16.gmra.mrb[28].mxu1 %v937_v15  ;;  %v945_v50 = vpack.c.bf16 %v912_v34, %v911_v39  ;;  %v910_v51 = vmax.f32 %v762_v43, 0.0  ;;  %v830_v0 = vmul.f32 %v2569_v48, %v2569_v48  ;;  %v831_v56 = vmul.f32 %v2584_v14, %v2584_v14 }
 0x117   : > { %v788_v40 = vadd.f32 %v787_v33, %v2555_v25  ;;  %v857_v37 = vadd.f32 %v856_v32, %v826_v31  ;;  %2131 = vmatprep.mubr.bf16.mxu1 %v2572_v58  ;;  %v829_v25 = vmul.f32 %v2566_v44, %v2566_v44  ;;  %v832_v60 = vmul.f32 %v2594_v29, %v2594_v29 }
 0x118   : > { %v944_v53 = vpack.c.bf16 %v910_v51, %v909_v41  ;;  %v833_v61 = vmul.f32 %v2579_v10, %v2579_v10  ;;  %v834_v2 = vmul.f32 %v2587_v18, %v2587_v18  ;;  %v835_v3 = vmul.f32 %v2610_v62, %v2610_v62 }
 0x119   : > { %v858_v46 = vadd.f32 %v857_v37, %v2591_v28  ;;  %v789_v47 = vadd.f32 %v788_v40, %v2561_v36  ;;  %v836_v7 = vmul.f32 %v746_v23, %v746_v23  ;;  %v839_v13 = vmul.f32 %v759_v27, %v759_v27 }
 0x11a   : > { %v840_v19 = vmul.f32 %v762_v43, %v762_v43 }
 0x11b   : > { %v790_v58 = vadd.f32 %v789_v47, %v2566_v44  ;;  %v859_v52 = vadd.f32 %v858_v46, %v828_v49 }
 0x11d   : > { %v860_v55 = vadd.f32 %v859_v52, %v829_v25  ;;  %v791_v28 = vadd.f32 %v790_v58, %v2569_v48 }
 0x11e   : > { %2132 = vmatmul.mubr.bf16.gmra.mrb[32].mxu1 %v2597_v35 }
 0x11f   : > { %v792_v36 = vadd.f32 %v791_v28, %v2584_v14  ;;  %v861_v57 = vadd.f32 %v860_v55, %v830_v0  ;;  %2135 = vmatprep.mubr.bf16.mxu1 %v940_v22  ;;  %v842_v22 = vmul.f32 %v2624_v30, %v2624_v30 }
 0x121   : > { %v862_v59 = vadd.f32 %v861_v57, %v831_v56  ;;  %v793_v44 = vadd.f32 %v792_v36, %v2594_v29 }
 0x123   : > { %v794_v48 = vadd.f32 %v793_v44, %v2579_v10  ;;  %v863_v1 = vadd.f32 %v862_v59, %v832_v60  ;;  %v837_v10 = vmul.f32 %v2605_v54, %v2605_v54 }
 0x125   : > { %v864_v35 = vadd.f32 %v863_v1, %v833_v61  ;;  %v795_v14 = vadd.f32 %v794_v48, %v2587_v18  ;;  %v838_v18 = vmul.f32 %v2613_v63, %v2613_v63 }
 0x126   : > { %2136 = vmatmul.mubr.bf16.gmra.mrb[36].mxu1 %v941_v24 }
 0x127   : > { %v796_v4 = vadd.f32 %v795_v14, %v2610_v62  ;;  %v865_v5 = vadd.f32 %v864_v35, %v834_v2  ;;  %2139 = vmatprep.mubr.bf16.mxu1 %v942_v42  ;;  %v2256_v42 = vld [vmem:[%s2871_s5 + $0x30] sm:$0xff]  }
 0x128   : > { %2159 = vmatprep.subr.bf16.mxu0 %v2256_v42 }
 0x129   : > { %v866_v29 = vadd.f32 %v865_v5, %v835_v3  ;;  %v797_v6 = vadd.f32 %v796_v4, %v746_v23  ;;  %2160 = vmatpush3.bf16.msra.mxu0 %v2256_v42 }
 0x12b   : > { %v798_v8 = vadd.f32 %v797_v6, %v2605_v54  ;;  %v867_v9 = vadd.f32 %v866_v29, %v836_v7  ;;  %v841_v54 = vmul.f32 %v2620_v26, %v2620_v26 }
 0x12d   : > { %v868_v11 = vadd.f32 %v867_v9, %v837_v10  ;;  %v799_v12 = vadd.f32 %v798_v8, %v2613_v63 }
 0x12e   : > { %2140 = vmatmul.mubr.bf16.gmra.mrb[40].mxu1 %v943_v45  ;;  %v2690_v45 = vld [vmem:[%s2870_s4] ss:$0 sm:$0xff] }
 0x12f   : > { %v800_v62 = vadd.f32 %v799_v12, %v759_v27  ;;  %v869_v15 = vadd.f32 %v868_v11, %v838_v18  ;;  %2143 = vmatprep.mubr.bf16.mxu1 %v944_v53 }
 0x131   : > { %v870_v16 = vadd.f32 %v869_v15, %v839_v13  ;;  %v801_v17 = vadd.f32 %v800_v62, %v762_v43  ;;  %v2257_v43 = vld [vmem:[%s2871_s5 + $0x38] sm:$0xff]  }
 0x132   : > { %2161 = vmatprep.subr.bf16.mxu0 %v2257_v43 }
 0x133   : > { %v802_v20 = vadd.f32 %v801_v17, %v2620_v26  ;;  %v871_v21 = vadd.f32 %v870_v16, %v840_v19  ;;  %2162 = vmatpush3.bf16.msra.mxu0 %v2257_v43 }
 0x135   : > { %v803_v63 = vadd.f32 %v802_v20, %v2624_v30  ;;  %v872_v23 = vadd.f32 %v871_v21, %v841_v54 }
 0x136   : > { %2144 = vmatmul.mubr.bf16.gmra.mrb[44].mxu1 %v945_v50 }
 0x137   : > { %v804_v24 = vrot.slane %v803_v63, 4  ;;  %v873_v27 = vadd.f32 %v872_v23, %v842_v22 }
 0x139   : > { %v805_v31 = vadd.f32 %v804_v24, %v803_v63  ;;  %v874_v32 = vrot.slane %v873_v27, 4 }
 0x13b   : > { %v806_v33 = vrot.slane %v805_v31, 2  ;;  %v875_v38 = vadd.f32 %v874_v32, %v873_v27 }
 0x13d   : > { %v807_v26 = vadd.f32 %v806_v33, %v805_v31  ;;  %v876_v39 = vrot.slane %v875_v38, 2 }
 0x13f   : > { %v808_v40 = vrot.slane %v807_v26, 1  ;;  %v877_v37 = vadd.f32 %v876_v39, %v875_v38 }
 0x141   : > { %v809_v30 = vadd.f32 %v808_v40, %v807_v26  ;;  %v878_v34 = vrot.slane %v877_v37, 1 }
 0x143   : > { %810 = vst [vmem:[%s475_s16] sm:$0x1] %v809_v30  ;;  %v879_v41 = vadd.f32 %v878_v34, %v877_v37  ;;  %s481_s16 = scalar_lea.vmem %s2876_s10, %s2671_s24 }
 0x145   : > { %880 = vst [vmem:[%s478_s21] sm:$0x1] %v879_v41  ;;  %s484_s21 = scalar_lea.vmem %s2877_s11, %s2671_s24 }
 0x1d1   : > { %v2117_v46 = vpop.f32.mrb[16].mxu1 }
 0x1d2   : > { %v1043_v47 = vadd.f32 %v2117_v46, %v2690_v45  ;;  %v1034_v49 = vpop.f32.mrb[17].mxu1 }
 0x1d3   : > { %v1035_v50 = vadd.f32 %v2690_v45, %v1034_v49  ;;  %v2118_v51 = vpop.f32.mrb[18].mxu1 }
 0x1d4   : > { %v1046_v25 = vadd.f32 %v2118_v51, %v2690_v45  ;;  %v1037_v58 = vpop.f32.mrb[19].mxu1  ;;  %v1271_v53 = vmax.f32 %v1043_v47, 0.0  ;;  %v1201_v44 = vmul.f32 %v1043_v47, %v1043_v47 }
 0x1d5   : > { %v1038_v52 = vadd.f32 %v2690_v45, %v1037_v58  ;;  %v1199_v0 = vmul.f32 %v1035_v50, %v1035_v50  ;;  %v1269_v28 = vmax.f32 %v1035_v50, 0.0 }
 0x1d6   : > { %v1272_v55 = vmax.f32 %v1046_v25, 0.0  ;;  %v1202_v2 = vmul.f32 %v1046_v25, %v1046_v25 }
 0x1d7   : > { %v1161_v56 = vadd.f32 %v1038_v52, %v1035_v50  ;;  %v1200_v36 = vmul.f32 %v1038_v52, %v1038_v52  ;;  %v1270_v57 = vmax.f32 %v1038_v52, 0.0 }
 0x1d8   : > { %v1319_v59 = vpack.c.bf16 %v1272_v55, %v1271_v53 }
 0x1d9   : > { %v1162_v60 = vadd.f32 %v1161_v56, %v1043_v47  ;;  %v1231_v61 = vadd.f32 %v1200_v36, %v1199_v0  ;;  %v1318_v48 = vpack.c.bf16 %v1270_v57, %v1269_v28  ;;  %v2121_v1 = vpop.f32.mrb[20].mxu1 }
 0x1da   : > { %v1059_v14 = vadd.f32 %v2121_v1, %v2690_v45  ;;  %v1050_v3 = vpop.f32.mrb[21].mxu1 }
 0x1db   : > { %v1232_v35 = vadd.f32 %v1231_v61, %v1201_v44  ;;  %v1163_v4 = vadd.f32 %v1162_v60, %v1046_v25  ;;  %2163 = vmatprep.mubr.bf16.mxu0 %v1318_v48  ;;  %v1051_v5 = vadd.f32 %v2690_v45, %v1050_v3  ;;  %v2122_v29 = vpop.f32.mrb[22].mxu1 }
 0x1dc   : > { %2164 = vmatmul.mubr.bf16.vlgmr.msra.gmra.mrb[16].mxu0 %v1319_v59  ;;  %v1062_v7 = vadd.f32 %v2122_v29, %v2690_v45  ;;  %v1053_v10 = vpop.f32.mrb[23].mxu1  ;;  %v1275_v11 = vmax.f32 %v1059_v14, 0.0  ;;  %v1205_v54 = vmul.f32 %v1059_v14, %v1059_v14 }
 0x1dd   : > { %v1233_v6 = vadd.f32 %v1232_v35, %v1202_v2  ;;  %v1164_v8 = vadd.f32 %v1163_v4, %v1051_v5  ;;  %v1203_v9 = vmul.f32 %v1051_v5, %v1051_v5  ;;  %v1054_v18 = vadd.f32 %v2690_v45, %v1053_v10 }
 0x1de   : > { %v1273_v12 = vmax.f32 %v1051_v5, 0.0  ;;  %v1276_v13 = vmax.f32 %v1062_v7, 0.0  ;;  %v1206_v27 = vmul.f32 %v1062_v7, %v1062_v7 }
 0x1df   : > { %v1234_v62 = vadd.f32 %v1233_v6, %v1203_v9  ;;  %v1165_v15 = vadd.f32 %v1164_v8, %v1054_v18  ;;  %v1204_v16 = vmul.f32 %v1054_v18, %v1054_v18  ;;  %v1274_v17 = vmax.f32 %v1054_v18, 0.0 }
 0x1e0   : > { %v1321_v19 = vpack.c.bf16 %v1276_v13, %v1275_v11 }
 0x1e1   : > { %v1166_v20 = vadd.f32 %v1165_v15, %v1059_v14  ;;  %v1235_v21 = vadd.f32 %v1234_v62, %v1204_v16  ;;  %v2125_v22 = vpop.f32.mrb[24].mxu1  ;;  %v1320_v63 = vpack.c.bf16 %v1274_v17, %v1273_v12 }
 0x1e2   : > { %v1075_v23 = vadd.f32 %v2125_v22, %v2690_v45  ;;  %v1066_v24 = vpop.f32.mrb[25].mxu1 }
 0x1e3   : > { %v1236_v31 = vadd.f32 %v1235_v21, %v1205_v54  ;;  %v1067_v32 = vadd.f32 %v2690_v45, %v1066_v24  ;;  %v1167_v33 = vadd.f32 %v1166_v20, %v1062_v7  ;;  %v2126_v38 = vpop.f32.mrb[26].mxu1  ;;  %2167 = vmatprep.mubr.bf16.mxu0 %v1320_v63 }
 0x1e4   : > { %v1078_v26 = vadd.f32 %v2126_v38, %v2690_v45  ;;  %v1069_v39 = vpop.f32.mrb[27].mxu1  ;;  %2168 = vmatmul.mubr.bf16.gmra.mrb[20].mxu0 %v1321_v19  ;;  %v1279_v34 = vmax.f32 %v1075_v23, 0.0  ;;  %v1209_v25 = vmul.f32 %v1075_v23, %v1075_v23 }
 0x1e5   : > { %v1168_v40 = vadd.f32 %v1167_v33, %v1067_v32  ;;  %v1207_v37 = vmul.f32 %v1067_v32, %v1067_v32  ;;  %v1237_v30 = vadd.f32 %v1236_v31, %v1206_v27  ;;  %v1070_v42 = vadd.f32 %v2690_v45, %v1069_v39 }
 0x1e6   : > { %v1280_v41 = vmax.f32 %v1078_v26, 0.0  ;;  %v1277_v46 = vmax.f32 %v1067_v32, 0.0  ;;  %v1210_v57 = vmul.f32 %v1078_v26, %v1078_v26 }
 0x1e7   : > { %v1238_v43 = vadd.f32 %v1237_v30, %v1207_v37  ;;  %v1169_v47 = vadd.f32 %v1168_v40, %v1070_v42  ;;  %v1208_v49 = vmul.f32 %v1070_v42, %v1070_v42  ;;  %v1278_v50 = vmax.f32 %v1070_v42, 0.0 }
 0x1e8   : > { %v1323_v51 = vpack.c.bf16 %v1280_v41, %v1279_v34 }
 0x1e9   : > { %v2129_v58 = vpop.f32.mrb[28].mxu1  ;;  %v1170_v52 = vadd.f32 %v1169_v47, %v1075_v23  ;;  %v1239_v53 = vadd.f32 %v1238_v43, %v1208_v49  ;;  %v1322_v28 = vpack.c.bf16 %v1278_v50, %v1277_v46 }
 0x1ea   : > { %v1091_v0 = vadd.f32 %v2129_v58, %v2690_v45  ;;  %v1082_v55 = vpop.f32.mrb[29].mxu1 }
 0x1eb   : > { %v1083_v56 = vadd.f32 %v2690_v45, %v1082_v55  ;;  %v2130_v36 = vpop.f32.mrb[30].mxu1  ;;  %v1240_v59 = vadd.f32 %v1239_v53, %v1209_v25  ;;  %v1171_v44 = vadd.f32 %v1170_v52, %v1078_v26  ;;  %2171 = vmatprep.mubr.bf16.mxu0 %v1322_v28 }
 0x1ec   : > { %v1085_v60 = vpop.f32.mrb[31].mxu1  ;;  %v1094_v48 = vadd.f32 %v2130_v36, %v2690_v45  ;;  %2172 = vmatmul.mubr.bf16.gmra.mrb[24].mxu0 %v1323_v51  ;;  %v1283_v2 = vmax.f32 %v1091_v0, 0.0  ;;  %v1213_v18 = vmul.f32 %v1091_v0, %v1091_v0 }
 0x1ed   : > { %v1211_v61 = vmul.f32 %v1083_v56, %v1083_v56  ;;  %v1086_v1 = vadd.f32 %v2690_v45, %v1085_v60  ;;  %v1172_v35 = vadd.f32 %v1171_v44, %v1083_v56  ;;  %v1241_v14 = vadd.f32 %v1240_v59, %v1210_v57 }
 0x1ee   : > { %v1281_v3 = vmax.f32 %v1083_v56, 0.0  ;;  %v1284_v4 = vmax.f32 %v1094_v48, 0.0  ;;  %v1214_v17 = vmul.f32 %v1094_v48, %v1094_v48 }
 0x1ef   : > { %v1212_v5 = vmul.f32 %v1086_v1, %v1086_v1  ;;  %v1282_v29 = vmax.f32 %v1086_v1, 0.0  ;;  %v1242_v6 = vadd.f32 %v1241_v14, %v1211_v61  ;;  %v1173_v7 = vadd.f32 %v1172_v35, %v1086_v1 }
 0x1f0   : > { %v1325_v9 = vpack.c.bf16 %v1284_v4, %v1283_v2 }
 0x1f1   : > { %v2133_v10 = vpop.f32.mrb[32].mxu1  ;;  %v1324_v8 = vpack.c.bf16 %v1282_v29, %v1281_v3  ;;  %v1174_v11 = vadd.f32 %v1173_v7, %v1091_v0  ;;  %v1243_v12 = vadd.f32 %v1242_v6, %v1212_v5 }
 0x1f2   : > { %v1107_v13 = vadd.f32 %v2133_v10, %v2690_v45  ;;  %v1098_v62 = vpop.f32.mrb[33].mxu1 }
 0x1f3   : > { %v1099_v15 = vadd.f32 %v2690_v45, %v1098_v62  ;;  %v2134_v16 = vpop.f32.mrb[34].mxu1  ;;  %2175 = vmatprep.mubr.bf16.mxu0 %v1324_v8  ;;  %v1244_v19 = vadd.f32 %v1243_v12, %v1213_v18  ;;  %v1175_v54 = vadd.f32 %v1174_v11, %v1094_v48 }
 0x1f4   : > { %v1101_v20 = vpop.f32.mrb[35].mxu1  ;;  %v1110_v22 = vadd.f32 %v2134_v16, %v2690_v45  ;;  %2176 = vmatmul.mubr.bf16.gmra.mrb[28].mxu0 %v1325_v9  ;;  %v1287_v23 = vmax.f32 %v1107_v13, 0.0  ;;  %v1217_v34 = vmul.f32 %v1107_v13, %v1107_v13 }
 0x1f5   : > { %v1215_v21 = vmul.f32 %v1099_v15, %v1099_v15  ;;  %v1102_v63 = vadd.f32 %v2690_v45, %v1101_v20  ;;  %v1176_v24 = vadd.f32 %v1175_v54, %v1099_v15  ;;  %v1245_v27 = vadd.f32 %v1244_v19, %v1214_v17 }
 0x1f6   : > { %v1285_v31 = vmax.f32 %v1099_v15, 0.0  ;;  %v1288_v32 = vmax.f32 %v1110_v22, 0.0  ;;  %v1218_v50 = vmul.f32 %v1110_v22, %v1110_v22 }
 0x1f7   : > { %v1216_v33 = vmul.f32 %v1102_v63, %v1102_v63  ;;  %v1286_v38 = vmax.f32 %v1102_v63, 0.0  ;;  %v1246_v26 = vadd.f32 %v1245_v27, %v1215_v21  ;;  %v1177_v39 = vadd.f32 %v1176_v24, %v1102_v63 }
 0x1f8   : > { %v1327_v30 = vpack.c.bf16 %v1288_v32, %v1287_v23 }
 0x1f9   : > { %v2137_v40 = vpop.f32.mrb[36].mxu1  ;;  %v1326_v37 = vpack.c.bf16 %v1286_v38, %v1285_v31  ;;  %v1178_v41 = vadd.f32 %v1177_v39, %v1107_v13  ;;  %v1247_v42 = vadd.f32 %v1246_v26, %v1216_v33 }
 0x1fa   : > { %v1123_v43 = vadd.f32 %v2137_v40, %v2690_v45  ;;  %v1114_v46 = vpop.f32.mrb[37].mxu1 }
 0x1fb   : > { %v1115_v47 = vadd.f32 %v2690_v45, %v1114_v46  ;;  %v2138_v49 = vpop.f32.mrb[38].mxu1  ;;  %2179 = vmatprep.mubr.bf16.mxu0 %v1326_v37  ;;  %v1248_v51 = vadd.f32 %v1247_v42, %v1217_v34  ;;  %v1179_v25 = vadd.f32 %v1178_v41, %v1110_v22 }
 0x1fc   : > { %v1117_v58 = vpop.f32.mrb[39].mxu1  ;;  %v1126_v53 = vadd.f32 %v2138_v49, %v2690_v45  ;;  %2180 = vmatmul.mubr.bf16.gmra.mrb[32].mxu0 %v1327_v30  ;;  %v1291_v55 = vmax.f32 %v1123_v43, 0.0  ;;  %v1221_v35 = vmul.f32 %v1123_v43, %v1123_v43 }
 0x1fd   : > { %v1219_v52 = vmul.f32 %v1115_v47, %v1115_v47  ;;  %v1118_v0 = vadd.f32 %v2690_v45, %v1117_v58  ;;  %v1180_v28 = vadd.f32 %v1179_v25, %v1115_v47  ;;  %v1249_v56 = vadd.f32 %v1248_v51, %v1218_v50 }
 0x1fe   : > { %v1289_v36 = vmax.f32 %v1115_v47, 0.0  ;;  %v1292_v57 = vmax.f32 %v1126_v53, 0.0  ;;  %v1222_v7 = vmul.f32 %v1126_v53, %v1126_v53 }
 0x1ff   : > { %v1220_v59 = vmul.f32 %v1118_v0, %v1118_v0  ;;  %v1290_v44 = vmax.f32 %v1118_v0, 0.0  ;;  %v1250_v60 = vadd.f32 %v1249_v56, %v1219_v52  ;;  %v1181_v61 = vadd.f32 %v1180_v28, %v1118_v0 }
 0x200   : > { %v1329_v2 = vpack.c.bf16 %v1292_v57, %v1291_v55 }
 0x201   : > { %v2141_v48 = vpop.f32.mrb[40].mxu1  ;;  %v1328_v1 = vpack.c.bf16 %v1290_v44, %v1289_v36  ;;  %v1182_v14 = vadd.f32 %v1181_v61, %v1123_v43  ;;  %v1251_v3 = vadd.f32 %v1250_v60, %v1220_v59 }
 0x202   : > { %v1139_v4 = vadd.f32 %v2141_v48, %v2690_v45  ;;  %v1130_v5 = vpop.f32.mrb[41].mxu1 }
 0x203   : > { %v1131_v29 = vadd.f32 %v2690_v45, %v1130_v5  ;;  %v2142_v6 = vpop.f32.mrb[42].mxu1  ;;  %2183 = vmatprep.mubr.bf16.mxu0 %v1328_v1  ;;  %v1252_v10 = vadd.f32 %v1251_v3, %v1221_v35  ;;  %v1183_v8 = vadd.f32 %v1182_v14, %v1126_v53 }
 0x204   : > { %v1133_v9 = vpop.f32.mrb[43].mxu1  ;;  %v1142_v11 = vadd.f32 %v2142_v6, %v2690_v45  ;;  %2184 = vmatmul.mubr.bf16.gmra.mrb[36].mxu0 %v1329_v2  ;;  %v1295_v13 = vmax.f32 %v1139_v4, 0.0  ;;  %v1225_v24 = vmul.f32 %v1139_v4, %v1139_v4  ;;  %v2736_v6 = vld [vmem:[%s2872_s6] ss:$0 sm:$0xff] }
 0x205   : > { %v1223_v18 = vmul.f32 %v1131_v29, %v1131_v29  ;;  %v1134_v12 = vadd.f32 %v2690_v45, %v1133_v9  ;;  %v1184_v62 = vadd.f32 %v1183_v8, %v1131_v29  ;;  %v1253_v15 = vadd.f32 %v1252_v10, %v1222_v7 }
 0x206   : > { %v1293_v16 = vmax.f32 %v1131_v29, 0.0  ;;  %v1296_v17 = vmax.f32 %v1142_v11, 0.0  ;;  %v1226_v39 = vmul.f32 %v1142_v11, %v1142_v11 }
 0x207   : > { %v1224_v19 = vmul.f32 %v1134_v12, %v1134_v12  ;;  %v1294_v54 = vmax.f32 %v1134_v12, 0.0  ;;  %v1254_v20 = vadd.f32 %v1253_v15, %v1223_v18  ;;  %v1185_v21 = vadd.f32 %v1184_v62, %v1134_v12 }
 0x208   : > { %v1331_v23 = vpack.c.bf16 %v1296_v17, %v1295_v13 }
 0x209   : > { %v2145_v22 = vpop.f32.mrb[44].mxu1  ;;  %v1330_v63 = vpack.c.bf16 %v1294_v54, %v1293_v16  ;;  %v1186_v27 = vadd.f32 %v1185_v21, %v1139_v4  ;;  %v1255_v31 = vadd.f32 %v1254_v20, %v1224_v19 }
 0x20a   : > { %v1155_v32 = vadd.f32 %v2145_v22, %v2690_v45  ;;  %v1146_v33 = vpop.f32.mrb[45].mxu1 }
 0x20b   : > { %v1147_v38 = vadd.f32 %v2690_v45, %v1146_v33  ;;  %v2146_v26 = vpop.f32.mrb[46].mxu1  ;;  %2187 = vmatprep.mubr.bf16.mxu0 %v1330_v63  ;;  %v1256_v40 = vadd.f32 %v1255_v31, %v1225_v24  ;;  %v1187_v37 = vadd.f32 %v1186_v27, %v1142_v11 }
 0x20c   : > { %v1149_v30 = vpop.f32.mrb[47].mxu1  ;;  %v1158_v41 = vadd.f32 %v2146_v26, %v2690_v45  ;;  %2188 = vmatmul.mubr.bf16.gmra.mrb[40].mxu0 %v1331_v23  ;;  %v1299_v43 = vmax.f32 %v1155_v32, 0.0  ;;  %v1229_v55 = vmul.f32 %v1155_v32, %v1155_v32 }
 0x20d   : > { %v1227_v34 = vmul.f32 %v1147_v38, %v1147_v38  ;;  %v1150_v42 = vadd.f32 %v2690_v45, %v1149_v30  ;;  %v1188_v46 = vadd.f32 %v1187_v37, %v1147_v38  ;;  %v1257_v47 = vadd.f32 %v1256_v40, %v1226_v39 }
 0x20e   : > { %v1297_v49 = vmax.f32 %v1147_v38, 0.0  ;;  %v1300_v50 = vmax.f32 %v1158_v41, 0.0  ;;  %v1230_v36 = vmul.f32 %v1158_v41, %v1158_v41 }
 0x20f   : > { %v1228_v51 = vmul.f32 %v1150_v42, %v1150_v42  ;;  %v1298_v25 = vmax.f32 %v1150_v42, 0.0  ;;  %v1258_v58 = vadd.f32 %v1257_v47, %v1227_v34  ;;  %v1189_v52 = vadd.f32 %v1188_v46, %v1150_v42 }
 0x210   : > { %v1333_v0 = vpack.c.bf16 %v1300_v50, %v1299_v43 }
 0x211   : > { %v1332_v53 = vpack.c.bf16 %v1298_v25, %v1297_v49  ;;  %v1190_v28 = vadd.f32 %v1189_v52, %v1155_v32  ;;  %v1259_v56 = vadd.f32 %v1258_v58, %v1228_v51 }
 0x213   : > { %2191 = vmatprep.mubr.bf16.mxu0 %v1332_v53  ;;  %v1191_v57 = vadd.f32 %v1190_v28, %v1158_v41  ;;  %v1260_v45 = vadd.f32 %v1259_v56, %v1229_v55 }
 0x214   : > { %2192 = vmatmul.mubr.bf16.gmra.mrb[44].mxu0 %v1333_v0 }
 0x215   : > { %v1192_v59 = vrot.slane %v1191_v57, 4  ;;  %v1261_v44 = vadd.f32 %v1260_v45, %v1230_v36 }
 0x217   : > { %v1193_v60 = vadd.f32 %v1192_v59, %v1191_v57  ;;  %v1262_v61 = vrot.slane %v1261_v44, 4 }
 0x219   : > { %v1194_v48 = vrot.slane %v1193_v60, 2  ;;  %v1263_v1 = vadd.f32 %v1262_v61, %v1261_v44 }
 0x21b   : > { %v1195_v2 = vadd.f32 %v1194_v48, %v1193_v60  ;;  %v1264_v35 = vrot.slane %v1263_v1, 2 }
 0x21d   : > { %v1196_v14 = vrot.slane %v1195_v2, 1  ;;  %v1265_v3 = vadd.f32 %v1264_v35, %v1263_v1 }
 0x21f   : > { %v1197_v4 = vadd.f32 %v1196_v14, %v1195_v2  ;;  %v1266_v5 = vrot.slane %v1265_v3, 1 }
 0x221   : > { %1198 = vst [vmem:[%s481_s16] sm:$0x1] %v1197_v4  ;;  %v1267_v29 = vadd.f32 %v1266_v5, %v1265_v3  ;;  %s1753_s16 = sshll.u32 %s2744_s0, 4  ;;  %s2810_s16 = int_to_ptr.vmem [resolvable:$true] %s1753_s16 }
 0x222   : > { %s2258_s23 = scalar_lea.vmem %s2810_s16, 4096  ;;  %p2265_p1 = scmp.lt.s32.totalorder %s2810_s16, %s2263_s15 }
 0x223   : > { %1268 = vst [vmem:[%s484_s21] sm:$0x1] %v1267_v29  ;;  %s2817_s21 = scalar_lea.sflag [#allocation3], %s433_s22  ;;  %p2259_p12 = scmp.ne.s32.totalorder %s2810_s16, %s2258_s23 }
 0x224   : > { %p2266_p2 = scmp.lt.s32.totalorder %s2264_s1, %s2258_s23 }
 0x225   : > { %p2260_p13 = pnand %p2259_p12, %p2433_p5 }
 0x226   : > { %p2267_p3 = por %p2266_p2, %p2265_p1 }
 0x227   : > { %p2261_p0 = pneg %p2260_p13 }
 0x229   : > { %p2268_p4 = pnand %p2267_p3, %p2261_p0 }
 0x2af   : > { %v2165_v7 = vpop.f32.mrb[16].mxu0 }
 0x2b0   : > { %v1431_v10 = vadd.f32 %v2165_v7, %v2736_v6  ;;  %v1422_v8 = vpop.f32.mrb[17].mxu0 }
 0x2b1   : > { %v1423_v9 = vadd.f32 %v2736_v6, %v1422_v8  ;;  %v2166_v18 = vpop.f32.mrb[18].mxu0 }
 0x2b2   : > { %v1659_v11 = vmax.f32 %v1431_v10, 0.0  ;;  %v1434_v12 = vadd.f32 %v2166_v18, %v2736_v6  ;;  %v1425_v13 = vpop.f32.mrb[19].mxu0  ;;  %v1589_v21 = vmul.f32 %v1431_v10, %v1431_v10 }
 0x2b3   : > { %v1657_v62 = vmax.f32 %v1423_v9, 0.0  ;;  %v1426_v15 = vadd.f32 %v2736_v6, %v1425_v13  ;;  %v1587_v17 = vmul.f32 %v1423_v9, %v1423_v9 }
 0x2b4   : > { %1691 = vst [vmem:[%s2744_s0 + $0x10] sm:$0xff] %v1659_v11  ;;  %v1660_v16 = vmax.f32 %v1434_v12, 0.0  ;;  %v1590_v24 = vmul.f32 %v1434_v12, %v1434_v12 }
 0x2b5   : > { %1689 = vst [vmem:[%s2744_s0] sm:$0xff] %v1657_v62  ;;  %v1549_v19 = vadd.f32 %v1426_v15, %v1423_v9  ;;  %v1588_v54 = vmul.f32 %v1426_v15, %v1426_v15  ;;  %v1658_v20 = vmax.f32 %v1426_v15, 0.0 }
 0x2b6   : > { %1692 = vst [vmem:[%s2744_s0 + $0x18] sm:$0xff] %v1660_v16 }
 0x2b7   : > { %v1550_v22 = vadd.f32 %v1549_v19, %v1431_v10  ;;  %v1619_v63 = vadd.f32 %v1588_v54, %v1587_v17  ;;  %1690 = vst [vmem:[%s2744_s0 + $0x8] sm:$0xff] %v1658_v20  ;;  %v2169_v23 = vpop.f32.mrb[20].mxu0 }
 0x2b8   : > { %v1447_v31 = vadd.f32 %v2169_v23, %v2736_v6  ;;  %v1438_v32 = vpop.f32.mrb[21].mxu0 }
 0x2b9   : > { %v1620_v27 = vadd.f32 %v1619_v63, %v1589_v21  ;;  %v1551_v33 = vadd.f32 %v1550_v22, %v1434_v12  ;;  %v1439_v38 = vadd.f32 %v2736_v6, %v1438_v32  ;;  %v2170_v26 = vpop.f32.mrb[22].mxu0 }
 0x2ba   : > { %v1663_v39 = vmax.f32 %v1447_v31, 0.0  ;;  %v1450_v37 = vadd.f32 %v2170_v26, %v2736_v6  ;;  %v1441_v30 = vpop.f32.mrb[23].mxu0  ;;  %v1593_v25 = vmul.f32 %v1447_v31, %v1447_v31 }
 0x2bb   : > { %v1621_v40 = vadd.f32 %v1620_v27, %v1590_v24  ;;  %v1552_v34 = vadd.f32 %v1551_v33, %v1439_v38  ;;  %v1591_v41 = vmul.f32 %v1439_v38, %v1439_v38  ;;  %v1661_v42 = vmax.f32 %v1439_v38, 0.0 }
 0x2bc   : > { %v1442_v43 = vadd.f32 %v2736_v6, %v1441_v30  ;;  %1695 = vst [vmem:[%s2744_s0 + $0x30] sm:$0xff] %v1663_v39  ;;  %v1664_v46 = vmax.f32 %v1450_v37, 0.0  ;;  %v1594_v0 = vmul.f32 %v1450_v37, %v1450_v37 }
 0x2bd   : > { %v1622_v47 = vadd.f32 %v1621_v40, %v1591_v41  ;;  %1693 = vst [vmem:[%s2744_s0 + $0x20] sm:$0xff] %v1661_v42 }
 0x2be   : > { %v1553_v49 = vadd.f32 %v1552_v34, %v1442_v43  ;;  %v1592_v50 = vmul.f32 %v1442_v43, %v1442_v43  ;;  %v1662_v51 = vmax.f32 %v1442_v43, 0.0  ;;  %1696 = vst [vmem:[%s2744_s0 + $0x38] sm:$0xff] %v1664_v46 }
 0x2bf   : > { %v2173_v53 = vpop.f32.mrb[24].mxu0 }
 0x2c0   : > { %v1554_v58 = vadd.f32 %v1553_v49, %v1447_v31  ;;  %v1623_v52 = vadd.f32 %v1622_v47, %v1592_v50  ;;  %1694 = vst [vmem:[%s2744_s0 + $0x28] sm:$0xff] %v1662_v51  ;;  %v1463_v28 = vadd.f32 %v2173_v53, %v2736_v6  ;;  %v1454_v56 = vpop.f32.mrb[25].mxu0 }
 0x2c1   : > { %v1455_v57 = vadd.f32 %v2736_v6, %v1454_v56  ;;  %v2174_v45 = vpop.f32.mrb[26].mxu0 }
 0x2c2   : > { %v1624_v55 = vadd.f32 %v1623_v52, %v1593_v25  ;;  %v1555_v36 = vadd.f32 %v1554_v58, %v1450_v37  ;;  %v1667_v59 = vmax.f32 %v1463_v28, 0.0  ;;  %v1466_v60 = vadd.f32 %v2174_v45, %v2736_v6  ;;  %v1457_v61 = vpop.f32.mrb[27].mxu0 }
 0x2c3   : > { %v1595_v1 = vmul.f32 %v1455_v57, %v1455_v57  ;;  %v1665_v2 = vmax.f32 %v1455_v57, 0.0  ;;  %v1458_v35 = vadd.f32 %v2736_v6, %v1457_v61  ;;  %v1597_v7 = vmul.f32 %v1463_v28, %v1463_v28 }
 0x2c4   : > { %v1625_v44 = vadd.f32 %v1624_v55, %v1594_v0  ;;  %v1556_v48 = vadd.f32 %v1555_v36, %v1455_v57  ;;  %1699 = vst [vmem:[%s2744_s0 + $0x50] sm:$0xff] %v1667_v59  ;;  %v1668_v14 = vmax.f32 %v1466_v60, 0.0  ;;  %v1598_v12 = vmul.f32 %v1466_v60, %v1466_v60 }
 0x2c5   : > { %1697 = vst [vmem:[%s2744_s0 + $0x40] sm:$0xff] %v1665_v2  ;;  %v1596_v5 = vmul.f32 %v1458_v35, %v1458_v35  ;;  %v1666_v29 = vmax.f32 %v1458_v35, 0.0 }
 0x2c6   : > { %v1626_v3 = vadd.f32 %v1625_v44, %v1595_v1  ;;  %v1557_v4 = vadd.f32 %v1556_v48, %v1458_v35  ;;  %1700 = vst [vmem:[%s2744_s0 + $0x58] sm:$0xff] %v1668_v14 }
 0x2c7   : > { %1698 = vst [vmem:[%s2744_s0 + $0x48] sm:$0xff] %v1666_v29  ;;  %v2177_v9 = vpop.f32.mrb[28].mxu0 }
 0x2c8   : > { %v1558_v10 = vadd.f32 %v1557_v4, %v1463_v28  ;;  %v1627_v8 = vadd.f32 %v1626_v3, %v1596_v5  ;;  %v1479_v18 = vadd.f32 %v2177_v9, %v2736_v6  ;;  %v1470_v11 = vpop.f32.mrb[29].mxu0 }
 0x2c9   : > { %v1471_v62 = vadd.f32 %v2736_v6, %v1470_v11  ;;  %v2178_v16 = vpop.f32.mrb[30].mxu0 }
 0x2ca   : > { %v1628_v13 = vadd.f32 %v1627_v8, %v1597_v7  ;;  %v1559_v15 = vadd.f32 %v1558_v10, %v1466_v60  ;;  %v1671_v17 = vmax.f32 %v1479_v18, 0.0  ;;  %v1482_v19 = vadd.f32 %v2178_v16, %v2736_v6  ;;  %v1473_v54 = vpop.f32.mrb[31].mxu0 }
 0x2cb   : > { %v1599_v21 = vmul.f32 %v1471_v62, %v1471_v62  ;;  %v1669_v63 = vmax.f32 %v1471_v62, 0.0  ;;  %v1474_v24 = vadd.f32 %v2736_v6, %v1473_v54  ;;  %v1601_v26 = vmul.f32 %v1479_v18, %v1479_v18 }
 0x2cc   : > { %v1560_v20 = vadd.f32 %v1559_v15, %v1471_v62  ;;  %v1629_v22 = vadd.f32 %v1628_v13, %v1598_v12  ;;  %1703 = vst [vmem:[%s2744_s0 + $0x70] sm:$0xff] %v1671_v17  ;;  %v1672_v23 = vmax.f32 %v1482_v19, 0.0  ;;  %v1602_v42 = vmul.f32 %v1482_v19, %v1482_v19 }
 0x2cd   : > { %1701 = vst [vmem:[%s2744_s0 + $0x60] sm:$0xff] %v1669_v63  ;;  %v1600_v32 = vmul.f32 %v1474_v24, %v1474_v24  ;;  %v1670_v33 = vmax.f32 %v1474_v24, 0.0 }
 0x2ce   : > { %v1630_v27 = vadd.f32 %v1629_v22, %v1599_v21  ;;  %1704 = vst [vmem:[%s2744_s0 + $0x78] sm:$0xff] %v1672_v23  ;;  %v1561_v31 = vadd.f32 %v1560_v20, %v1474_v24 }
 0x2cf   : > { %v2181_v38 = vpop.f32.mrb[32].mxu0  ;;  %1702 = vst [vmem:[%s2744_s0 + $0x68] sm:$0xff] %v1670_v33 }
 0x2d0   : > { %v1562_v39 = vadd.f32 %v1561_v31, %v1479_v18  ;;  %v1631_v40 = vadd.f32 %v1630_v27, %v1600_v32  ;;  %v1495_v37 = vadd.f32 %v2181_v38, %v2736_v6  ;;  %v1486_v30 = vpop.f32.mrb[33].mxu0 }
 0x2d1   : > { %v1487_v34 = vadd.f32 %v2736_v6, %v1486_v30  ;;  %v2182_v41 = vpop.f32.mrb[34].mxu0 }
 0x2d2   : > { %v1632_v43 = vadd.f32 %v1631_v40, %v1601_v26  ;;  %v1675_v46 = vmax.f32 %v1495_v37, 0.0  ;;  %v1563_v47 = vadd.f32 %v1562_v39, %v1482_v19  ;;  %v1489_v49 = vpop.f32.mrb[35].mxu0  ;;  %v1498_v25 = vadd.f32 %v2182_v41, %v2736_v6 }
 0x2d3   : > { %v1603_v50 = vmul.f32 %v1487_v34, %v1487_v34  ;;  %v1673_v51 = vmax.f32 %v1487_v34, 0.0  ;;  %v1490_v58 = vadd.f32 %v2736_v6, %v1489_v49  ;;  %v1605_v45 = vmul.f32 %v1495_v37, %v1495_v37 }
 0x2d4   : > { %1707 = vst [vmem:[%s2744_s0 + $0x90] sm:$0xff] %v1675_v46  ;;  %v1564_v52 = vadd.f32 %v1563_v47, %v1487_v34  ;;  %v1633_v53 = vadd.f32 %v1632_v43, %v1602_v42  ;;  %v1676_v0 = vmax.f32 %v1498_v25, 0.0  ;;  %v1606_v2 = vmul.f32 %v1498_v25, %v1498_v25 }
 0x2d5   : > { %1705 = vst [vmem:[%s2744_s0 + $0x80] sm:$0xff] %v1673_v51  ;;  %v1604_v55 = vmul.f32 %v1490_v58, %v1490_v58  ;;  %v1674_v28 = vmax.f32 %v1490_v58, 0.0 }
 0x2d6   : > { %v1634_v56 = vadd.f32 %v1633_v53, %v1603_v50  ;;  %v1565_v36 = vadd.f32 %v1564_v52, %v1490_v58  ;;  %1708 = vst [vmem:[%s2744_s0 + $0x98] sm:$0xff] %v1676_v0 }
 0x2d7   : > { %1706 = vst [vmem:[%s2744_s0 + $0x88] sm:$0xff] %v1674_v28  ;;  %v2185_v57 = vpop.f32.mrb[36].mxu0 }
 0x2d8   : > { %v1566_v59 = vadd.f32 %v1565_v36, %v1495_v37  ;;  %v1635_v44 = vadd.f32 %v1634_v56, %v1604_v55  ;;  %v1511_v60 = vadd.f32 %v2185_v57, %v2736_v6  ;;  %v1502_v61 = vpop.f32.mrb[37].mxu0 }
 0x2d9   : > { %v1503_v48 = vadd.f32 %v2736_v6, %v1502_v61  ;;  %v2186_v1 = vpop.f32.mrb[38].mxu0 }
 0x2da   : > { %v1636_v35 = vadd.f32 %v1635_v44, %v1605_v45  ;;  %v1679_v14 = vmax.f32 %v1511_v60, 0.0  ;;  %v1567_v3 = vadd.f32 %v1566_v59, %v1498_v25  ;;  %v1505_v4 = vpop.f32.mrb[39].mxu0  ;;  %v1514_v7 = vadd.f32 %v2186_v1, %v2736_v6 }
 0x2db   : > { %v1607_v5 = vmul.f32 %v1503_v48, %v1503_v48  ;;  %v1677_v29 = vmax.f32 %v1503_v48, 0.0  ;;  %v1506_v10 = vadd.f32 %v2736_v6, %v1505_v4  ;;  %v1609_v16 = vmul.f32 %v1511_v60, %v1511_v60 }
 0x2dc   : > { %1711 = vst [vmem:[%s2744_s0 + $0xb0] sm:$0xff] %v1679_v14  ;;  %v1568_v8 = vadd.f32 %v1567_v3, %v1503_v48  ;;  %v1637_v9 = vadd.f32 %v1636_v35, %v1606_v2  ;;  %v1680_v18 = vmax.f32 %v1514_v7, 0.0  ;;  %v1610_v63 = vmul.f32 %v1514_v7, %v1514_v7 }
 0x2dd   : > { %1709 = vst [vmem:[%s2744_s0 + $0xa0] sm:$0xff] %v1677_v29  ;;  %v1608_v11 = vmul.f32 %v1506_v10, %v1506_v10  ;;  %v1678_v12 = vmax.f32 %v1506_v10, 0.0 }
 0x2de   : > { %v1638_v13 = vadd.f32 %v1637_v9, %v1607_v5  ;;  %v1569_v62 = vadd.f32 %v1568_v8, %v1506_v10  ;;  %1712 = vst [vmem:[%s2744_s0 + $0xb8] sm:$0xff] %v1680_v18 }
 0x2df   : > { %1710 = vst [vmem:[%s2744_s0 + $0xa8] sm:$0xff] %v1678_v12  ;;  %v2189_v15 = vpop.f32.mrb[40].mxu0 }
 0x2e0   : > { %v1570_v17 = vadd.f32 %v1569_v62, %v1511_v60  ;;  %v1639_v19 = vadd.f32 %v1638_v13, %v1608_v11  ;;  %v1527_v54 = vadd.f32 %v2189_v15, %v2736_v6  ;;  %v1518_v20 = vpop.f32.mrb[41].mxu0 }
 0x2e1   : > { %v1519_v21 = vadd.f32 %v2736_v6, %v1518_v20  ;;  %v2190_v22 = vpop.f32.mrb[42].mxu0 }
 0x2e2   : > { %v1640_v23 = vadd.f32 %v1639_v19, %v1609_v16  ;;  %v1683_v24 = vmax.f32 %v1527_v54, 0.0  ;;  %v1571_v27 = vadd.f32 %v1570_v17, %v1514_v7  ;;  %v1521_v31 = vpop.f32.mrb[43].mxu0  ;;  %v1530_v38 = vadd.f32 %v2190_v22, %v2736_v6 }
 0x2e3   : > { %v1611_v32 = vmul.f32 %v1519_v21, %v1519_v21  ;;  %v1681_v33 = vmax.f32 %v1519_v21, 0.0  ;;  %v1522_v26 = vadd.f32 %v2736_v6, %v1521_v31  ;;  %v1613_v46 = vmul.f32 %v1527_v54, %v1527_v54 }
 0x2e4   : > { %1715 = vst [vmem:[%s2744_s0 + $0xd0] sm:$0xff] %v1683_v24  ;;  %v1572_v39 = vadd.f32 %v1571_v27, %v1519_v21  ;;  %v1641_v40 = vadd.f32 %v1640_v23, %v1610_v63  ;;  %v1684_v37 = vmax.f32 %v1530_v38, 0.0  ;;  %v1614_v52 = vmul.f32 %v1530_v38, %v1530_v38 }
 0x2e5   : > { %1713 = vst [vmem:[%s2744_s0 + $0xc0] sm:$0xff] %v1681_v33  ;;  %v1612_v30 = vmul.f32 %v1522_v26, %v1522_v26  ;;  %v1682_v34 = vmax.f32 %v1522_v26, 0.0 }
 0x2e6   : > { %v1642_v41 = vadd.f32 %v1641_v40, %v1611_v32  ;;  %v1573_v42 = vadd.f32 %v1572_v39, %v1522_v26  ;;  %1716 = vst [vmem:[%s2744_s0 + $0xd8] sm:$0xff] %v1684_v37 }
 0x2e7   : > { %1714 = vst [vmem:[%s2744_s0 + $0xc8] sm:$0xff] %v1682_v34  ;;  %v2193_v43 = vpop.f32.mrb[44].mxu0 }
 0x2e8   : > { %v1574_v47 = vadd.f32 %v1573_v42, %v1527_v54  ;;  %v1643_v49 = vadd.f32 %v1642_v41, %v1612_v30  ;;  %v1543_v50 = vadd.f32 %v2193_v43, %v2736_v6  ;;  %v1534_v51 = vpop.f32.mrb[45].mxu0 }
 0x2e9   : > { %v1535_v25 = vadd.f32 %v2736_v6, %v1534_v51  ;;  %v2194_v58 = vpop.f32.mrb[46].mxu0 }
 0x2ea   : > { %v1644_v53 = vadd.f32 %v1643_v49, %v1613_v46  ;;  %v1687_v0 = vmax.f32 %v1543_v50, 0.0  ;;  %v1575_v55 = vadd.f32 %v1574_v47, %v1530_v38  ;;  %v1537_v28 = vpop.f32.mrb[47].mxu0  ;;  %v1546_v57 = vadd.f32 %v2194_v58, %v2736_v6 }
 0x2eb   : > { %v1615_v56 = vmul.f32 %v1535_v25, %v1535_v25  ;;  %v1685_v36 = vmax.f32 %v1535_v25, 0.0  ;;  %v1538_v45 = vadd.f32 %v2736_v6, %v1537_v28  ;;  %v1617_v2 = vmul.f32 %v1543_v50, %v1543_v50 }
 0x2ec   : > { %1719 = vst [vmem:[%s2744_s0 + $0xf0] sm:$0xff] %v1687_v0  ;;  %v1576_v59 = vadd.f32 %v1575_v55, %v1535_v25  ;;  %v1645_v44 = vadd.f32 %v1644_v53, %v1614_v52  ;;  %v1688_v60 = vmax.f32 %v1546_v57, 0.0 }
 0x2ed   : > { %1717 = vst [vmem:[%s2744_s0 + $0xe0] sm:$0xff] %v1685_v36  ;;  %v1616_v61 = vmul.f32 %v1538_v45, %v1538_v45  ;;  %v1686_v48 = vmax.f32 %v1538_v45, 0.0 }
 0x2ee   : > { %v1646_v1 = vadd.f32 %v1645_v44, %v1615_v56  ;;  %v1577_v6 = vadd.f32 %v1576_v59, %v1538_v45  ;;  %1720 = vst [vmem:[%s2744_s0 + $0xf8] sm:$0xff] %v1688_v60 }
 0x2ef   : > { %1718 = vst [vmem:[%s2744_s0 + $0xe8] sm:$0xff] %v1686_v48 }
 0x2f0   : > { %v1578_v35 = vadd.f32 %v1577_v6, %v1543_v50  ;;  %v1647_v14 = vadd.f32 %v1646_v1, %v1616_v61 }
 0x2f1   : > { %2271 = shalt.err (!%p2268_p4)
}
 0x2f2   : > { %s2272_s22 = scalar_lea.hbm %s2808_s20, 4096  ;;  %s2276_s17 = scalar_lea.hbm %s2873_s7, 8192 }
 0x2f3   : > { %p2273_p7 = scmp.ne.s32.totalorder %s2808_s20, %s2272_s22  ;;  %p2277_p10 = scmp.lt.u32.totalorder %s2808_s20, %s2873_s7 }
 0x2f4   : > { %p2278_p11 = scmp.lt.u32.totalorder %s2276_s17, %s2272_s22  ;;  %p2280_p13 = scmp.lt.u32.totalorder %s2272_s22, %s2808_s20 }
 0x2f5   : > { %p2274_p8 = pnand %p2273_p7, %p2433_p5 }
 0x2f6   : > { %p2279_p12 = por %p2278_p11, %p2277_p10 }
 0x2f7   : > { %p2275_p9 = pneg %p2274_p8 }
 0x2f8   : > { %p2281_p0 = por %p2280_p13, %p2279_p12 }
 0x2fa   : > { %p2282_p1 = pnand %p2281_p0, %p2275_p9 }
 0x2fc   : > { %2285 = shalt.err (!%p2282_p1)
}
 0x2fd   : > { %s2323_s23 = smov 128   ;;  %s2324_s1 = smov 8   ;;  %v1618_v3 = vmul.f32 %v1546_v57, %v1546_v57  ;;  %v1579_v4 = vadd.f32 %v1578_v35, %v1546_v57  ;;  %v1648_v5 = vadd.f32 %v1647_v14, %v1617_v2 }
 0x2fe   : > { %2199 = dma.vmem_to_hbm [thread:$0]  (%p2433_p5), %s2810_s16, 4096, %s2808_s20, %s2817_s21, %s2323_s23, %s2323_s23, %s2324_s1  }
 0x2ff   : > { %v1580_v29 = vrot.slane %v1579_v4, 4  ;;  %v1649_v7 = vadd.f32 %v1648_v5, %v1618_v3  ;;  %s487_s29 = scalar_lea.vmem %s2878_s12, %s2671_s24  ;;  %s490_s20 = scalar_lea.vmem %s2879_s13, %s2671_s24 }
 0x301   : > { %v1581_v10 = vadd.f32 %v1580_v29, %v1579_v4  ;;  %v1650_v8 = vrot.slane %v1649_v7, 4 }
 0x303   : > { %v1582_v9 = vrot.slane %v1581_v10, 2  ;;  %v1651_v18 = vadd.f32 %v1650_v8, %v1649_v7 }
 0x305   : > { %v1583_v11 = vadd.f32 %v1582_v9, %v1581_v10  ;;  %v1652_v12 = vrot.slane %v1651_v18, 2 }
 0x307   : > { %v1584_v13 = vrot.slane %v1583_v11, 1  ;;  %v1653_v62 = vadd.f32 %v1652_v12, %v1651_v18 }
 0x309   : > { %v1585_v15 = vadd.f32 %v1584_v13, %v1583_v11  ;;  %v1654_v16 = vrot.slane %v1653_v62, 1 }
 0x30b   : > { %1586 = vst [vmem:[%s487_s29] sm:$0x1] %v1585_v15  ;;  %v1655_v17 = vadd.f32 %v1654_v16, %v1653_v62 }
 0x30d   : > { %1656 = vst [vmem:[%s490_s20] sm:$0x1] %v1655_v17 }
 0x30e PF: > { %p2205_p5 = scmp.ge.s32.totalorder %s2320_s28, 2  ;;  %s1786_s21 = sand.u32 1, %s2308_s25  }
 0x30f   : > { %s1787_s17 = scalar_lea.sflag [#allocation3], %s1786_s21 }
 0x310   : > { %p2202_p2 = pnand %p2205_p5, %p2437_p6 }
 0x312   : > { %2303 = dma.done.wait (!%p2202_p2), %s1787_s17, 4096  }
 0x313   : > { %2305 = vsyncadd (!%p2202_p2), %s1787_s17, 4294963200  ;;  %s2887_s30 = sld [smem:[#allocation5_spill]]  ;;  %p24_p3 = scmp.ge.s32.totalorder %s2420_s14, 4  }
 0x314   : > { %s2888_s25 = smov %s2312_s26  ;;  %s2889_s26 = smov %s2316_s27 }
 0x315   : > { %s2891_s28 = smov %s2420_s14  ;;  %26 = sbr.rel (!%p24_p3) target bundleno = 6 (0x6), region = 155 }
 0x319   : > { %s2890_s27 = smov %s2887_s30 }
 0x31c   :  { %1828 = vsyncpa [#allocation3], 1 }
 0x31d   :  { %1830 = vsyncpa [#allocation3 + $0x1], 1 }

</bundles_post_ra>
